<compile_context>
chip_gen: v7x
topology: tpu7x:2x2x1
jax: 0.10.0
libtpu: 0.0.40
codegen_flags: <defaults>
</compile_context>

<pallas_src>
import functools

import jax
import jax.numpy as jnp
from jax import lax
from jax.experimental import pallas as pl
from jax.experimental.pallas import tpu as pltpu


def _round_up(x, m):
    return ((x + m - 1) // m) * m


# ----------------------------------------------------------------------------
# Pallas kernel: fully fused multi-layer LSTM over the whole sequence
# ----------------------------------------------------------------------------
def fused_lstm_kernel(*refs, seq_len, num_layers, Hq, Gp):
    """
    Operand order (all VMEM, whole-array):
      x_ref     : (sp, in_p)                bf16   layer-0 input (zero padded)
      w_ih0_ref : (in_p, Gp)                bf16   layer-0 input weights (packed gates)
      w_ihr_ref : (L-1, Hq, Gp)             bf16   layers 1..L-1 input weights (only if L > 1)
      w_hh_ref  : (L, Hq, Gp)               bf16   recurrent weights
      b_ref     : (L, 1, Gp)                f32    b_ih + b_hh
      out_ref   : (1, Hq)                   f32    final hidden state of last layer
    Gate packing along the Gp lane axis: [ i | f | g | o ], each block Hq wide.
    """
    if num_layers > 1:
        x_ref, w_ih0_ref, w_ihr_ref, w_hh_ref, b_ref, out_ref = refs
    else:
        x_ref, w_ih0_ref, w_hh_ref, b_ref, out_ref = refs
        w_ihr_ref = None

    # Lane-index mask selecting the cell ('g') gate block -> tanh; others sigmoid.
    # Hoisted out of the loops (broadcast_in_dim is not CSE'd by JAX).
    lane = lax.broadcasted_iota(jnp.int32, (1, Gp), 1)
    g_mask = (lane >= 2 * Hq) & (lane < 3 * Hq)

    x_seq = x_ref[...]                                      # (sp, in_p) bf16

    h = jnp.zeros((1, Hq), jnp.float32)
    for layer in range(num_layers):
        w_ih_t = w_ih0_ref[...] if layer == 0 else w_ihr_ref[layer - 1]   # (*, Gp) bf16
        w_hh_t = w_hh_ref[layer]                                          # (Hq, Gp) bf16
        bias = b_ref[layer]                                               # (1, Gp) f32

        # Dense input projection for the whole sequence (one MXU pass per layer).
        gates_ih = jnp.dot(x_seq, w_ih_t,
                           preferred_element_type=jnp.float32) + bias     # (sp, Gp) f32

        # Serial recurrence; h / c are natural-width register values.
        h = jnp.zeros((1, Hq), jnp.float32)
        c = jnp.zeros((1, Hq), jnp.float32)
        hs = []
        for t in range(seq_len):
            pre = jnp.dot(h.astype(jnp.bfloat16), w_hh_t,
                          preferred_element_type=jnp.float32) + gates_ih[t:t + 1, :]
            # One sigmoid + one tanh pass over the packed 128-lane gate vector.
            act = jnp.where(g_mask, jnp.tanh(pre), jax.nn.sigmoid(pre))   # (1, Gp)
            i_g = act[:, 0 * Hq:1 * Hq]
            f_g = act[:, 1 * Hq:2 * Hq]
            g_g = act[:, 2 * Hq:3 * Hq]
            o_g = act[:, 3 * Hq:4 * Hq]
            c = f_g * c + i_g * g_g
            h = o_g * jnp.tanh(c)
            hs.append(h)

        if layer + 1 < num_layers:
            # Next layer consumes the full hidden sequence (stays in registers).
            x_seq = jnp.concatenate(hs, axis=0).astype(jnp.bfloat16)      # (seq_len, Hq)

    out_ref[...] = h                                        # only the final timestep matters


# ----------------------------------------------------------------------------
# One-time weight packing (PyTorch layout -> packed-gate, transposed, bf16)
# ----------------------------------------------------------------------------
def pack_lstm_params(lstm_params, hidden_dim, input_dim):
    """Pack once at init; NOT part of the per-call forward path."""
    H = hidden_dim
    Hq = _round_up(max(H, 1), 16)          # gate block width (bf16-friendly K dim)
    Gp = _round_up(4 * Hq, 128)            # packed gate axis, lane-dense
    in_p = _round_up(max(input_dim, 1), 128)
    num_layers = len(lstm_params)

    def pack_layer(w_ih, w_hh, b_ih, b_hh, rows, in_dim):
        w_ih_t = jnp.zeros((rows, Gp), jnp.float32)
        w_hh_t = jnp.zeros((Hq, Gp), jnp.float32)
        b = jnp.zeros((1, Gp), jnp.float32)
        for g in range(4):                 # PyTorch gate order: i, f, g, o
            w_ih_t = w_ih_t.at[:in_dim, g * Hq:g * Hq + H].set(
                w_ih[g * H:(g + 1) * H, :].T)
            w_hh_t = w_hh_t.at[:H, g * Hq:g * Hq + H].set(
                w_hh[g * H:(g + 1) * H, :].T)
            b = b.at[0, g * Hq:g * Hq + H].set(
                b_ih[g * H:(g + 1) * H] + b_hh[g * H:(g + 1) * H])
        return w_ih_t, w_hh_t, b

    w_ih0_t, w_hh0_t, b0 = pack_layer(*lstm_params[0], in_p, input_dim)
    w_ihr_list, w_hh_list, b_list = [], [w_hh0_t], [b0]
    for layer in range(1, num_layers):
        w_ih_t, w_hh_t, b = pack_layer(*lstm_params[layer], Hq, H)
        w_ihr_list.append(w_ih_t)
        w_hh_list.append(w_hh_t)
        b_list.append(b)

    return {
        "H": H, "Hq": Hq, "Gp": Gp, "in_dim": input_dim, "in_p": in_p,
        "num_layers": num_layers,
        "w_ih0": w_ih0_t.astype(jnp.bfloat16),
        "w_ihr": (jnp.stack(w_ihr_list).astype(jnp.bfloat16)
                  if w_ihr_list else None),                 # absent if num_layers == 1
        "w_hh": jnp.stack(w_hh_list).astype(jnp.bfloat16),  # (L, Hq, Gp)
        "b": jnp.stack(b_list),                             # (L, 1, Gp) f32
    }


def fused_lstm_pallas(x, packed):
    """Run the whole stacked LSTM in one pallas_call (pre-packed weights)."""
    seq_len, in_dim = x.shape
    assert in_dim == packed["in_dim"], (in_dim, packed["in_dim"])
    H, Hq, Gp, in_p = packed["H"], packed["Hq"], packed["Gp"], packed["in_p"]
    num_layers = packed["num_layers"]
    sp = _round_up(max(seq_len, 1), 8)

    x_pad = jnp.zeros((sp, in_p), jnp.bfloat16).at[:seq_len, :in_dim].set(
        x.astype(jnp.bfloat16))

    operands = [x_pad, packed["w_ih0"]]
    if num_layers > 1:
        operands.append(packed["w_ihr"])
    operands += [packed["w_hh"], packed["b"]]

    kernel = functools.partial(fused_lstm_kernel, seq_len=seq_len,
                               num_layers=num_layers, Hq=Hq, Gp=Gp)
    out = pl.pallas_call(
        kernel,
        out_shape=jax.ShapeDtypeStruct((1, Hq), jnp.float32),
        in_specs=[pl.BlockSpec(memory_space=pltpu.MemorySpace.VMEM)] * len(operands),
        out_specs=pl.BlockSpec(memory_space=pltpu.MemorySpace.VMEM),
        compiler_params=pltpu.CompilerParams(vmem_limit_bytes=32 * 1024 * 1024),
    )(*operands)
    return out[0, :H]


# ----------------------------------------------------------------------------
# Parameter init (deterministic, PyTorch-like uniform(-1/sqrt(H), 1/sqrt(H)))
# ----------------------------------------------------------------------------
def init_params(key, vocab_sizes, embedding_dim, numerical_dim, hidden_dim, num_layers):
    n_emb = len(vocab_sizes)
    keys = jax.random.split(key, n_emb + 4 * num_layers)

    embeddings = [
        jax.random.normal(keys[i], (v, embedding_dim), jnp.float32)
        for i, v in enumerate(vocab_sizes)
    ]

    input_size = n_emb * embedding_dim + numerical_dim
    k = 1.0 / (hidden_dim ** 0.5)
    lstm = []
    idx = n_emb
    for layer in range(num_layers):
        in_dim = input_size if layer == 0 else hidden_dim
        w_ih = jax.random.uniform(keys[idx + 0], (4 * hidden_dim, in_dim), jnp.float32, -k, k)
        w_hh = jax.random.uniform(keys[idx + 1], (4 * hidden_dim, hidden_dim), jnp.float32, -k, k)
        b_ih = jax.random.uniform(keys[idx + 2], (4 * hidden_dim,), jnp.float32, -k, k)
        b_hh = jax.random.uniform(keys[idx + 3], (4 * hidden_dim,), jnp.float32, -k, k)
        idx += 4
        lstm.append((w_ih, w_hh, b_ih, b_hh))

    return {"embeddings": embeddings, "lstm": lstm}


# ----------------------------------------------------------------------------
# Forward passes
# ----------------------------------------------------------------------------
def kernel_encoder_forward(embeddings, packed_lstm, categorical_inputs, numerical_inputs):
    # Embedding lookups (glue: gather in plain JAX), concat with numerical feats.
    embedded = [
        jnp.take(emb, categorical_inputs[:, i], axis=0)
        for i, emb in enumerate(embeddings)
    ]
    x = jnp.concatenate(embedded + [numerical_inputs.astype(jnp.float32)], axis=-1)
    # Entire stacked LSTM in a single fused Pallas kernel.
    # nn.LSTM inter-layer dropout is train-only; inference forward is identity.
    return fused_lstm_pallas(x, packed_lstm)


def kernel_encoder_reference(params, categorical_inputs, numerical_inputs, hidden_dim):
    """Pure-JAX f32 reference matching PyTorch LSTM semantics."""
    embedded = [
        jnp.take(emb, categorical_inputs[:, i], axis=0)
        for i, emb in enumerate(params["embeddings"])
    ]
    x = jnp.concatenate(embedded + [numerical_inputs.astype(jnp.float32)], axis=-1)
    H = hidden_dim
    for (w_ih, w_hh, b_ih, b_hh) in params["lstm"]:
        def step(carry, x_t):
            h, c = carry
            gates = x_t @ w_ih.T + h @ w_hh.T + b_ih + b_hh
            i_g = jax.nn.sigmoid(gates[0 * H:1 * H])
            f_g = jax.nn.sigmoid(gates[1 * H:2 * H])
            g_g = jnp.tanh(gates[2 * H:3 * H])
            o_g = jax.nn.sigmoid(gates[3 * H:4 * H])
            c_t = f_g * c + i_g * g_g
            h_t = o_g * jnp.tanh(c_t)
            return (h_t, c_t), h_t

        init = (jnp.zeros((H,), jnp.float32), jnp.zeros((H,), jnp.float32))
        _, x = lax.scan(step, init, x)
    return x[-1]


# ----------------------------------------------------------------------------
if __name__ == "__main__":
    vocab_sizes = [5, 7, 9]
    embedding_dim = 8
    numerical_dim = 4
    hidden_dim = 32
    num_layers = 2
    dropout_prob = 0.1   # unused at inference
    seq_len = 8

    root = jax.random.PRNGKey(0)
    k_params, k_cat, k_num = jax.random.split(root, 3)

    params = init_params(
        k_params, vocab_sizes, embedding_dim, numerical_dim, hidden_dim, num_layers
    )
    input_size = len(vocab_sizes) * embedding_dim + numerical_dim
    # Pack / pad weights ONCE (not per forward call).
    packed_lstm = pack_lstm_params(params["lstm"], hidden_dim, input_size)

    categorical_inputs = jnp.stack(
        [
            jax.random.randint(jax.random.fold_in(k_cat, i), (seq_len,), 0, v, dtype=jnp.int32)
            for i, v in enumerate(vocab_sizes)
        ],
        axis=-1,
    )  # (seq_len, num_categorical)
    numerical_inputs = jax.random.normal(k_num, (seq_len, numerical_dim), jnp.float32)

    out = kernel_encoder_forward(params["embeddings"], packed_lstm,
                                 categorical_inputs, numerical_inputs)
    out = jax.block_until_ready(out)

    ref = kernel_encoder_reference(params, categorical_inputs, numerical_inputs, hidden_dim)
    assert out.shape == (hidden_dim,), out.shape
    # bf16 matmul operands with f32 accumulation -> loosened parity tolerance.
    assert jnp.allclose(out, ref, atol=3e-2, rtol=3e-2), (out, ref)

    print("KERNEL_OK")
</pallas_src>

<mosaic_0001>
module attributes {stable_mosaic.version = 11 : i64} {
  func.func @fused_lstm_kernel(%arg0: memref<8x128xbf16, #tpu.memory_space<vmem>>, %arg1: memref<128x128xbf16, #tpu.memory_space<vmem>>, %arg2: memref<1x32x128xbf16, #tpu.memory_space<vmem>>, %arg3: memref<2x32x128xbf16, #tpu.memory_space<vmem>>, %arg4: memref<2x1x128xf32, #tpu.memory_space<vmem>>, %arg5: memref<1x32xf32, #tpu.memory_space<vmem>>) attributes {dimension_semantics = [], scalar_prefetch = 0 : i64, scratch_operands = 0 : i64, tpu.core_type = #tpu.core_type<tc>} {
    %0 = tpu.iota {dimensions = array<i32: 1>} : vector<1x128xi32>
    %c64_i32 = arith.constant 64 : i32
    %1 = vector.broadcast %c64_i32 : i32 to vector<1x128xi32>
    %2 = arith.cmpi sge, %0, %1 : vector<1x128xi32>
    %c96_i32 = arith.constant 96 : i32
    %3 = vector.broadcast %c96_i32 : i32 to vector<1x128xi32>
    %4 = arith.cmpi slt, %0, %3 : vector<1x128xi32>
    %5 = arith.andi %2, %4 : vector<1x128xi1>
    %c0 = arith.constant 0 : index
    %c0_0 = arith.constant 0 : index
    %6 = vector.load %arg0[%c0, %c0_0] : memref<8x128xbf16, #tpu.memory_space<vmem>>, vector<8x128xbf16>
    %c0_1 = arith.constant 0 : index
    %c0_2 = arith.constant 0 : index
    %7 = vector.load %arg1[%c0_1, %c0_2] : memref<128x128xbf16, #tpu.memory_space<vmem>>, vector<128x128xbf16>
    %c0_3 = arith.constant 0 : index
    %c0_4 = arith.constant 0 : index
    %c0_5 = arith.constant 0 : index
    %8 = vector.load %arg3[%c0_3, %c0_4, %c0_5] : memref<2x32x128xbf16, #tpu.memory_space<vmem>>, vector<1x32x128xbf16>
    %9 = vector.shape_cast %8 : vector<1x32x128xbf16> to vector<32x128xbf16>
    %c0_6 = arith.constant 0 : index
    %c0_7 = arith.constant 0 : index
    %c0_8 = arith.constant 0 : index
    %10 = vector.load %arg4[%c0_6, %c0_7, %c0_8] : memref<2x1x128xf32, #tpu.memory_space<vmem>>, vector<1x1x128xf32>
    %11 = vector.shape_cast %10 : vector<1x1x128xf32> to vector<1x128xf32>
    %cst = arith.constant dense<0.000000e+00> : vector<8x128xf32>
    %12 = tpu.matmul %6, %7, %cst {dimension_numbers = #tpu.dot_dimension_numbers<[1], [0], [0], [1], [0, 0, 1, 1], [], []>} : vector<8x128xbf16>, vector<128x128xbf16>, vector<8x128xf32> -> vector<8x128xf32>
    %13 = vector.broadcast %11 : vector<1x128xf32> to vector<8x128xf32>
    %14 = arith.addf %12, %13 : vector<8x128xf32>
    %cst_9 = arith.constant 0.000000e+00 : f32
    %15 = vector.broadcast %cst_9 : f32 to vector<1x32xf32>
    %cst_10 = arith.constant 0.000000e+00 : f32
    %16 = vector.broadcast %cst_10 : f32 to vector<1x32xf32>
    %17 = arith.truncf %15 : vector<1x32xf32> to vector<1x32xbf16>
    %cst_11 = arith.constant dense<0.000000e+00> : vector<1x128xf32>
    %18 = tpu.matmul %17, %9, %cst_11 {dimension_numbers = #tpu.dot_dimension_numbers<[1], [0], [0], [1], [0, 0, 1, 1], [], []>} : vector<1x32xbf16>, vector<32x128xbf16>, vector<1x128xf32> -> vector<1x128xf32>
    %19 = vector.extract_strided_slice %14 {offsets = [0, 0], sizes = [1, 128], strides = [1, 1]} : vector<8x128xf32> to vector<1x128xf32>
    %20 = arith.addf %18, %19 : vector<1x128xf32>
    %21 = math.tanh %20 : vector<1x128xf32>
    %22 = arith.negf %20 : vector<1x128xf32>
    %23 = math.exp %22 : vector<1x128xf32>
    %cst_12 = arith.constant 1.000000e+00 : f32
    %24 = vector.broadcast %cst_12 : f32 to vector<1x128xf32>
    %25 = arith.addf %24, %23 : vector<1x128xf32>
    %26 = arith.divf %24, %25 : vector<1x128xf32>
    %27 = arith.select %5, %21, %26 : vector<1x128xi1>, vector<1x128xf32>
    %28 = vector.extract_strided_slice %27 {offsets = [0, 0], sizes = [1, 32], strides = [1, 1]} : vector<1x128xf32> to vector<1x32xf32>
    %29 = vector.extract_strided_slice %27 {offsets = [0, 32], sizes = [1, 32], strides = [1, 1]} : vector<1x128xf32> to vector<1x32xf32>
    %30 = vector.extract_strided_slice %27 {offsets = [0, 64], sizes = [1, 32], strides = [1, 1]} : vector<1x128xf32> to vector<1x32xf32>
    %31 = vector.extract_strided_slice %27 {offsets = [0, 96], sizes = [1, 32], strides = [1, 1]} : vector<1x128xf32> to vector<1x32xf32>
    %32 = arith.mulf %29, %16 : vector<1x32xf32>
    %33 = arith.mulf %28, %30 : vector<1x32xf32>
    %34 = arith.addf %32, %33 : vector<1x32xf32>
    %35 = math.tanh %34 : vector<1x32xf32>
    %36 = arith.mulf %31, %35 : vector<1x32xf32>
    %37 = arith.truncf %36 : vector<1x32xf32> to vector<1x32xbf16>
    %cst_13 = arith.constant dense<0.000000e+00> : vector<1x128xf32>
    %38 = tpu.matmul %37, %9, %cst_13 {dimension_numbers = #tpu.dot_dimension_numbers<[1], [0], [0], [1], [0, 0, 1, 1], [], []>} : vector<1x32xbf16>, vector<32x128xbf16>, vector<1x128xf32> -> vector<1x128xf32>
    %39 = vector.extract_strided_slice %14 {offsets = [1, 0], sizes = [1, 128], strides = [1, 1]} : vector<8x128xf32> to vector<1x128xf32>
    %40 = arith.addf %38, %39 : vector<1x128xf32>
    %41 = math.tanh %40 : vector<1x128xf32>
    %42 = arith.negf %40 : vector<1x128xf32>
    %43 = math.exp %42 : vector<1x128xf32>
    %cst_14 = arith.constant 1.000000e+00 : f32
    %44 = vector.broadcast %cst_14 : f32 to vector<1x128xf32>
    %45 = arith.addf %44, %43 : vector<1x128xf32>
    %46 = arith.divf %44, %45 : vector<1x128xf32>
    %47 = arith.select %5, %41, %46 : vector<1x128xi1>, vector<1x128xf32>
    %48 = vector.extract_strided_slice %47 {offsets = [0, 0], sizes = [1, 32], strides = [1, 1]} : vector<1x128xf32> to vector<1x32xf32>
    %49 = vector.extract_strided_slice %47 {offsets = [0, 32], sizes = [1, 32], strides = [1, 1]} : vector<1x128xf32> to vector<1x32xf32>
    %50 = vector.extract_strided_slice %47 {offsets = [0, 64], sizes = [1, 32], strides = [1, 1]} : vector<1x128xf32> to vector<1x32xf32>
    %51 = vector.extract_strided_slice %47 {offsets = [0, 96], sizes = [1, 32], strides = [1, 1]} : vector<1x128xf32> to vector<1x32xf32>
    %52 = arith.mulf %49, %34 : vector<1x32xf32>
    %53 = arith.mulf %48, %50 : vector<1x32xf32>
    %54 = arith.addf %52, %53 : vector<1x32xf32>
    %55 = math.tanh %54 : vector<1x32xf32>
    %56 = arith.mulf %51, %55 : vector<1x32xf32>
    %57 = arith.truncf %56 : vector<1x32xf32> to vector<1x32xbf16>
    %cst_15 = arith.constant dense<0.000000e+00> : vector<1x128xf32>
    %58 = tpu.matmul %57, %9, %cst_15 {dimension_numbers = #tpu.dot_dimension_numbers<[1], [0], [0], [1], [0, 0, 1, 1], [], []>} : vector<1x32xbf16>, vector<32x128xbf16>, vector<1x128xf32> -> vector<1x128xf32>
    %59 = vector.extract_strided_slice %14 {offsets = [2, 0], sizes = [1, 128], strides = [1, 1]} : vector<8x128xf32> to vector<1x128xf32>
    %60 = arith.addf %58, %59 : vector<1x128xf32>
    %61 = math.tanh %60 : vector<1x128xf32>
    %62 = arith.negf %60 : vector<1x128xf32>
    %63 = math.exp %62 : vector<1x128xf32>
    %cst_16 = arith.constant 1.000000e+00 : f32
    %64 = vector.broadcast %cst_16 : f32 to vector<1x128xf32>
    %65 = arith.addf %64, %63 : vector<1x128xf32>
    %66 = arith.divf %64, %65 : vector<1x128xf32>
    %67 = arith.select %5, %61, %66 : vector<1x128xi1>, vector<1x128xf32>
    %68 = vector.extract_strided_slice %67 {offsets = [0, 0], sizes = [1, 32], strides = [1, 1]} : vector<1x128xf32> to vector<1x32xf32>
    %69 = vector.extract_strided_slice %67 {offsets = [0, 32], sizes = [1, 32], strides = [1, 1]} : vector<1x128xf32> to vector<1x32xf32>
    %70 = vector.extract_strided_slice %67 {offsets = [0, 64], sizes = [1, 32], strides = [1, 1]} : vector<1x128xf32> to vector<1x32xf32>
    %71 = vector.extract_strided_slice %67 {offsets = [0, 96], sizes = [1, 32], strides = [1, 1]} : vector<1x128xf32> to vector<1x32xf32>
    %72 = arith.mulf %69, %54 : vector<1x32xf32>
    %73 = arith.mulf %68, %70 : vector<1x32xf32>
    %74 = arith.addf %72, %73 : vector<1x32xf32>
    %75 = math.tanh %74 : vector<1x32xf32>
    %76 = arith.mulf %71, %75 : vector<1x32xf32>
    %77 = arith.truncf %76 : vector<1x32xf32> to vector<1x32xbf16>
    %cst_17 = arith.constant dense<0.000000e+00> : vector<1x128xf32>
    %78 = tpu.matmul %77, %9, %cst_17 {dimension_numbers = #tpu.dot_dimension_numbers<[1], [0], [0], [1], [0, 0, 1, 1], [], []>} : vector<1x32xbf16>, vector<32x128xbf16>, vector<1x128xf32> -> vector<1x128xf32>
    %79 = vector.extract_strided_slice %14 {offsets = [3, 0], sizes = [1, 128], strides = [1, 1]} : vector<8x128xf32> to vector<1x128xf32>
    %80 = arith.addf %78, %79 : vector<1x128xf32>
    %81 = math.tanh %80 : vector<1x128xf32>
    %82 = arith.negf %80 : vector<1x128xf32>
    %83 = math.exp %82 : vector<1x128xf32>
    %cst_18 = arith.constant 1.000000e+00 : f32
    %84 = vector.broadcast %cst_18 : f32 to vector<1x128xf32>
    %85 = arith.addf %84, %83 : vector<1x128xf32>
    %86 = arith.divf %84, %85 : vector<1x128xf32>
    %87 = arith.select %5, %81, %86 : vector<1x128xi1>, vector<1x128xf32>
    %88 = vector.extract_strided_slice %87 {offsets = [0, 0], sizes = [1, 32], strides = [1, 1]} : vector<1x128xf32> to vector<1x32xf32>
    %89 = vector.extract_strided_slice %87 {offsets = [0, 32], sizes = [1, 32], strides = [1, 1]} : vector<1x128xf32> to vector<1x32xf32>
    %90 = vector.extract_strided_slice %87 {offsets = [0, 64], sizes = [1, 32], strides = [1, 1]} : vector<1x128xf32> to vector<1x32xf32>
    %91 = vector.extract_strided_slice %87 {offsets = [0, 96], sizes = [1, 32], strides = [1, 1]} : vector<1x128xf32> to vector<1x32xf32>
    %92 = arith.mulf %89, %74 : vector<1x32xf32>
    %93 = arith.mulf %88, %90 : vector<1x32xf32>
    %94 = arith.addf %92, %93 : vector<1x32xf32>
    %95 = math.tanh %94 : vector<1x32xf32>
    %96 = arith.mulf %91, %95 : vector<1x32xf32>
    %97 = arith.truncf %96 : vector<1x32xf32> to vector<1x32xbf16>
    %cst_19 = arith.constant dense<0.000000e+00> : vector<1x128xf32>
    %98 = tpu.matmul %97, %9, %cst_19 {dimension_numbers = #tpu.dot_dimension_numbers<[1], [0], [0], [1], [0, 0, 1, 1], [], []>} : vector<1x32xbf16>, vector<32x128xbf16>, vector<1x128xf32> -> vector<1x128xf32>
    %99 = vector.extract_strided_slice %14 {offsets = [4, 0], sizes = [1, 128], strides = [1, 1]} : vector<8x128xf32> to vector<1x128xf32>
    %100 = arith.addf %98, %99 : vector<1x128xf32>
    %101 = math.tanh %100 : vector<1x128xf32>
    %102 = arith.negf %100 : vector<1x128xf32>
    %103 = math.exp %102 : vector<1x128xf32>
    %cst_20 = arith.constant 1.000000e+00 : f32
    %104 = vector.broadcast %cst_20 : f32 to vector<1x128xf32>
    %105 = arith.addf %104, %103 : vector<1x128xf32>
    %106 = arith.divf %104, %105 : vector<1x128xf32>
    %107 = arith.select %5, %101, %106 : vector<1x128xi1>, vector<1x128xf32>
    %108 = vector.extract_strided_slice %107 {offsets = [0, 0], sizes = [1, 32], strides = [1, 1]} : vector<1x128xf32> to vector<1x32xf32>
    %109 = vector.extract_strided_slice %107 {offsets = [0, 32], sizes = [1, 32], strides = [1, 1]} : vector<1x128xf32> to vector<1x32xf32>
    %110 = vector.extract_strided_slice %107 {offsets = [0, 64], sizes = [1, 32], strides = [1, 1]} : vector<1x128xf32> to vector<1x32xf32>
    %111 = vector.extract_strided_slice %107 {offsets = [0, 96], sizes = [1, 32], strides = [1, 1]} : vector<1x128xf32> to vector<1x32xf32>
    %112 = arith.mulf %109, %94 : vector<1x32xf32>
    %113 = arith.mulf %108, %110 : vector<1x32xf32>
    %114 = arith.addf %112, %113 : vector<1x32xf32>
    %115 = math.tanh %114 : vector<1x32xf32>
    %116 = arith.mulf %111, %115 : vector<1x32xf32>
    %117 = arith.truncf %116 : vector<1x32xf32> to vector<1x32xbf16>
    %cst_21 = arith.constant dense<0.000000e+00> : vector<1x128xf32>
    %118 = tpu.matmul %117, %9, %cst_21 {dimension_numbers = #tpu.dot_dimension_numbers<[1], [0], [0], [1], [0, 0, 1, 1], [], []>} : vector<1x32xbf16>, vector<32x128xbf16>, vector<1x128xf32> -> vector<1x128xf32>
    %119 = vector.extract_strided_slice %14 {offsets = [5, 0], sizes = [1, 128], strides = [1, 1]} : vector<8x128xf32> to vector<1x128xf32>
    %120 = arith.addf %118, %119 : vector<1x128xf32>
    %121 = math.tanh %120 : vector<1x128xf32>
    %122 = arith.negf %120 : vector<1x128xf32>
    %123 = math.exp %122 : vector<1x128xf32>
    %cst_22 = arith.constant 1.000000e+00 : f32
    %124 = vector.broadcast %cst_22 : f32 to vector<1x128xf32>
    %125 = arith.addf %124, %123 : vector<1x128xf32>
    %126 = arith.divf %124, %125 : vector<1x128xf32>
    %127 = arith.select %5, %121, %126 : vector<1x128xi1>, vector<1x128xf32>
    %128 = vector.extract_strided_slice %127 {offsets = [0, 0], sizes = [1, 32], strides = [1, 1]} : vector<1x128xf32> to vector<1x32xf32>
    %129 = vector.extract_strided_slice %127 {offsets = [0, 32], sizes = [1, 32], strides = [1, 1]} : vector<1x128xf32> to vector<1x32xf32>
    %130 = vector.extract_strided_slice %127 {offsets = [0, 64], sizes = [1, 32], strides = [1, 1]} : vector<1x128xf32> to vector<1x32xf32>
    %131 = vector.extract_strided_slice %127 {offsets = [0, 96], sizes = [1, 32], strides = [1, 1]} : vector<1x128xf32> to vector<1x32xf32>
    %132 = arith.mulf %129, %114 : vector<1x32xf32>
    %133 = arith.mulf %128, %130 : vector<1x32xf32>
    %134 = arith.addf %132, %133 : vector<1x32xf32>
    %135 = math.tanh %134 : vector<1x32xf32>
    %136 = arith.mulf %131, %135 : vector<1x32xf32>
    %137 = arith.truncf %136 : vector<1x32xf32> to vector<1x32xbf16>
    %cst_23 = arith.constant dense<0.000000e+00> : vector<1x128xf32>
    %138 = tpu.matmul %137, %9, %cst_23 {dimension_numbers = #tpu.dot_dimension_numbers<[1], [0], [0], [1], [0, 0, 1, 1], [], []>} : vector<1x32xbf16>, vector<32x128xbf16>, vector<1x128xf32> -> vector<1x128xf32>
    %139 = vector.extract_strided_slice %14 {offsets = [6, 0], sizes = [1, 128], strides = [1, 1]} : vector<8x128xf32> to vector<1x128xf32>
    %140 = arith.addf %138, %139 : vector<1x128xf32>
    %141 = math.tanh %140 : vector<1x128xf32>
    %142 = arith.negf %140 : vector<1x128xf32>
    %143 = math.exp %142 : vector<1x128xf32>
    %cst_24 = arith.constant 1.000000e+00 : f32
    %144 = vector.broadcast %cst_24 : f32 to vector<1x128xf32>
    %145 = arith.addf %144, %143 : vector<1x128xf32>
    %146 = arith.divf %144, %145 : vector<1x128xf32>
    %147 = arith.select %5, %141, %146 : vector<1x128xi1>, vector<1x128xf32>
    %148 = vector.extract_strided_slice %147 {offsets = [0, 0], sizes = [1, 32], strides = [1, 1]} : vector<1x128xf32> to vector<1x32xf32>
    %149 = vector.extract_strided_slice %147 {offsets = [0, 32], sizes = [1, 32], strides = [1, 1]} : vector<1x128xf32> to vector<1x32xf32>
    %150 = vector.extract_strided_slice %147 {offsets = [0, 64], sizes = [1, 32], strides = [1, 1]} : vector<1x128xf32> to vector<1x32xf32>
    %151 = vector.extract_strided_slice %147 {offsets = [0, 96], sizes = [1, 32], strides = [1, 1]} : vector<1x128xf32> to vector<1x32xf32>
    %152 = arith.mulf %149, %134 : vector<1x32xf32>
    %153 = arith.mulf %148, %150 : vector<1x32xf32>
    %154 = arith.addf %152, %153 : vector<1x32xf32>
    %155 = math.tanh %154 : vector<1x32xf32>
    %156 = arith.mulf %151, %155 : vector<1x32xf32>
    %157 = arith.truncf %156 : vector<1x32xf32> to vector<1x32xbf16>
    %cst_25 = arith.constant dense<0.000000e+00> : vector<1x128xf32>
    %158 = tpu.matmul %157, %9, %cst_25 {dimension_numbers = #tpu.dot_dimension_numbers<[1], [0], [0], [1], [0, 0, 1, 1], [], []>} : vector<1x32xbf16>, vector<32x128xbf16>, vector<1x128xf32> -> vector<1x128xf32>
    %159 = vector.extract_strided_slice %14 {offsets = [7, 0], sizes = [1, 128], strides = [1, 1]} : vector<8x128xf32> to vector<1x128xf32>
    %160 = arith.addf %158, %159 : vector<1x128xf32>
    %161 = math.tanh %160 : vector<1x128xf32>
    %162 = arith.negf %160 : vector<1x128xf32>
    %163 = math.exp %162 : vector<1x128xf32>
    %cst_26 = arith.constant 1.000000e+00 : f32
    %164 = vector.broadcast %cst_26 : f32 to vector<1x128xf32>
    %165 = arith.addf %164, %163 : vector<1x128xf32>
    %166 = arith.divf %164, %165 : vector<1x128xf32>
    %167 = arith.select %5, %161, %166 : vector<1x128xi1>, vector<1x128xf32>
    %168 = vector.extract_strided_slice %167 {offsets = [0, 0], sizes = [1, 32], strides = [1, 1]} : vector<1x128xf32> to vector<1x32xf32>
    %169 = vector.extract_strided_slice %167 {offsets = [0, 32], sizes = [1, 32], strides = [1, 1]} : vector<1x128xf32> to vector<1x32xf32>
    %170 = vector.extract_strided_slice %167 {offsets = [0, 64], sizes = [1, 32], strides = [1, 1]} : vector<1x128xf32> to vector<1x32xf32>
    %171 = vector.extract_strided_slice %167 {offsets = [0, 96], sizes = [1, 32], strides = [1, 1]} : vector<1x128xf32> to vector<1x32xf32>
    %172 = arith.mulf %169, %154 : vector<1x32xf32>
    %173 = arith.mulf %168, %170 : vector<1x32xf32>
    %174 = arith.addf %172, %173 : vector<1x32xf32>
    %175 = math.tanh %174 : vector<1x32xf32>
    %176 = arith.mulf %171, %175 : vector<1x32xf32>
    %177 = tpu.concatenate %36, %56, %76, %96, %116, %136, %156, %176 in 0 : vector<1x32xf32>, vector<1x32xf32>, vector<1x32xf32>, vector<1x32xf32>, vector<1x32xf32>, vector<1x32xf32>, vector<1x32xf32>, vector<1x32xf32> -> vector<8x32xf32>
    %178 = arith.truncf %177 : vector<8x32xf32> to vector<8x32xbf16>
    %c0_27 = arith.constant 0 : index
    %c0_28 = arith.constant 0 : index
    %c0_29 = arith.constant 0 : index
    %179 = vector.load %arg2[%c0_27, %c0_28, %c0_29] : memref<1x32x128xbf16, #tpu.memory_space<vmem>>, vector<1x32x128xbf16>
    %180 = vector.shape_cast %179 : vector<1x32x128xbf16> to vector<32x128xbf16>
    %c1 = arith.constant 1 : index
    %c0_30 = arith.constant 0 : index
    %c0_31 = arith.constant 0 : index
    %181 = vector.load %arg3[%c1, %c0_30, %c0_31] : memref<2x32x128xbf16, #tpu.memory_space<vmem>>, vector<1x32x128xbf16>
    %182 = vector.shape_cast %181 : vector<1x32x128xbf16> to vector<32x128xbf16>
    %c1_32 = arith.constant 1 : index
    %c0_33 = arith.constant 0 : index
    %c0_34 = arith.constant 0 : index
    %183 = vector.load %arg4[%c1_32, %c0_33, %c0_34] : memref<2x1x128xf32, #tpu.memory_space<vmem>>, vector<1x1x128xf32>
    %184 = vector.shape_cast %183 : vector<1x1x128xf32> to vector<1x128xf32>
    %cst_35 = arith.constant dense<0.000000e+00> : vector<8x128xf32>
    %185 = tpu.matmul %178, %180, %cst_35 {dimension_numbers = #tpu.dot_dimension_numbers<[1], [0], [0], [1], [0, 0, 1, 1], [], []>} : vector<8x32xbf16>, vector<32x128xbf16>, vector<8x128xf32> -> vector<8x128xf32>
    %186 = vector.broadcast %184 : vector<1x128xf32> to vector<8x128xf32>
    %187 = arith.addf %185, %186 : vector<8x128xf32>
    %cst_36 = arith.constant 0.000000e+00 : f32
    %188 = vector.broadcast %cst_36 : f32 to vector<1x32xf32>
    %cst_37 = arith.constant 0.000000e+00 : f32
    %189 = vector.broadcast %cst_37 : f32 to vector<1x32xf32>
    %190 = arith.truncf %188 : vector<1x32xf32> to vector<1x32xbf16>
    %cst_38 = arith.constant dense<0.000000e+00> : vector<1x128xf32>
    %191 = tpu.matmul %190, %182, %cst_38 {dimension_numbers = #tpu.dot_dimension_numbers<[1], [0], [0], [1], [0, 0, 1, 1], [], []>} : vector<1x32xbf16>, vector<32x128xbf16>, vector<1x128xf32> -> vector<1x128xf32>
    %192 = vector.extract_strided_slice %187 {offsets = [0, 0], sizes = [1, 128], strides = [1, 1]} : vector<8x128xf32> to vector<1x128xf32>
    %193 = arith.addf %191, %192 : vector<1x128xf32>
    %194 = math.tanh %193 : vector<1x128xf32>
    %195 = arith.negf %193 : vector<1x128xf32>
    %196 = math.exp %195 : vector<1x128xf32>
    %cst_39 = arith.constant 1.000000e+00 : f32
    %197 = vector.broadcast %cst_39 : f32 to vector<1x128xf32>
    %198 = arith.addf %197, %196 : vector<1x128xf32>
    %199 = arith.divf %197, %198 : vector<1x128xf32>
    %200 = arith.select %5, %194, %199 : vector<1x128xi1>, vector<1x128xf32>
    %201 = vector.extract_strided_slice %200 {offsets = [0, 0], sizes = [1, 32], strides = [1, 1]} : vector<1x128xf32> to vector<1x32xf32>
    %202 = vector.extract_strided_slice %200 {offsets = [0, 32], sizes = [1, 32], strides = [1, 1]} : vector<1x128xf32> to vector<1x32xf32>
    %203 = vector.extract_strided_slice %200 {offsets = [0, 64], sizes = [1, 32], strides = [1, 1]} : vector<1x128xf32> to vector<1x32xf32>
    %204 = vector.extract_strided_slice %200 {offsets = [0, 96], sizes = [1, 32], strides = [1, 1]} : vector<1x128xf32> to vector<1x32xf32>
    %205 = arith.mulf %202, %189 : vector<1x32xf32>
    %206 = arith.mulf %201, %203 : vector<1x32xf32>
    %207 = arith.addf %205, %206 : vector<1x32xf32>
    %208 = math.tanh %207 : vector<1x32xf32>
    %209 = arith.mulf %204, %208 : vector<1x32xf32>
    %210 = arith.truncf %209 : vector<1x32xf32> to vector<1x32xbf16>
    %cst_40 = arith.constant dense<0.000000e+00> : vector<1x128xf32>
    %211 = tpu.matmul %210, %182, %cst_40 {dimension_numbers = #tpu.dot_dimension_numbers<[1], [0], [0], [1], [0, 0, 1, 1], [], []>} : vector<1x32xbf16>, vector<32x128xbf16>, vector<1x128xf32> -> vector<1x128xf32>
    %212 = vector.extract_strided_slice %187 {offsets = [1, 0], sizes = [1, 128], strides = [1, 1]} : vector<8x128xf32> to vector<1x128xf32>
    %213 = arith.addf %211, %212 : vector<1x128xf32>
    %214 = math.tanh %213 : vector<1x128xf32>
    %215 = arith.negf %213 : vector<1x128xf32>
    %216 = math.exp %215 : vector<1x128xf32>
    %cst_41 = arith.constant 1.000000e+00 : f32
    %217 = vector.broadcast %cst_41 : f32 to vector<1x128xf32>
    %218 = arith.addf %217, %216 : vector<1x128xf32>
    %219 = arith.divf %217, %218 : vector<1x128xf32>
    %220 = arith.select %5, %214, %219 : vector<1x128xi1>, vector<1x128xf32>
    %221 = vector.extract_strided_slice %220 {offsets = [0, 0], sizes = [1, 32], strides = [1, 1]} : vector<1x128xf32> to vector<1x32xf32>
    %222 = vector.extract_strided_slice %220 {offsets = [0, 32], sizes = [1, 32], strides = [1, 1]} : vector<1x128xf32> to vector<1x32xf32>
    %223 = vector.extract_strided_slice %220 {offsets = [0, 64], sizes = [1, 32], strides = [1, 1]} : vector<1x128xf32> to vector<1x32xf32>
    %224 = vector.extract_strided_slice %220 {offsets = [0, 96], sizes = [1, 32], strides = [1, 1]} : vector<1x128xf32> to vector<1x32xf32>
    %225 = arith.mulf %222, %207 : vector<1x32xf32>
    %226 = arith.mulf %221, %223 : vector<1x32xf32>
    %227 = arith.addf %225, %226 : vector<1x32xf32>
    %228 = math.tanh %227 : vector<1x32xf32>
    %229 = arith.mulf %224, %228 : vector<1x32xf32>
    %230 = arith.truncf %229 : vector<1x32xf32> to vector<1x32xbf16>
    %cst_42 = arith.constant dense<0.000000e+00> : vector<1x128xf32>
    %231 = tpu.matmul %230, %182, %cst_42 {dimension_numbers = #tpu.dot_dimension_numbers<[1], [0], [0], [1], [0, 0, 1, 1], [], []>} : vector<1x32xbf16>, vector<32x128xbf16>, vector<1x128xf32> -> vector<1x128xf32>
    %232 = vector.extract_strided_slice %187 {offsets = [2, 0], sizes = [1, 128], strides = [1, 1]} : vector<8x128xf32> to vector<1x128xf32>
    %233 = arith.addf %231, %232 : vector<1x128xf32>
    %234 = math.tanh %233 : vector<1x128xf32>
    %235 = arith.negf %233 : vector<1x128xf32>
    %236 = math.exp %235 : vector<1x128xf32>
    %cst_43 = arith.constant 1.000000e+00 : f32
    %237 = vector.broadcast %cst_43 : f32 to vector<1x128xf32>
    %238 = arith.addf %237, %236 : vector<1x128xf32>
    %239 = arith.divf %237, %238 : vector<1x128xf32>
    %240 = arith.select %5, %234, %239 : vector<1x128xi1>, vector<1x128xf32>
    %241 = vector.extract_strided_slice %240 {offsets = [0, 0], sizes = [1, 32], strides = [1, 1]} : vector<1x128xf32> to vector<1x32xf32>
    %242 = vector.extract_strided_slice %240 {offsets = [0, 32], sizes = [1, 32], strides = [1, 1]} : vector<1x128xf32> to vector<1x32xf32>
    %243 = vector.extract_strided_slice %240 {offsets = [0, 64], sizes = [1, 32], strides = [1, 1]} : vector<1x128xf32> to vector<1x32xf32>
    %244 = vector.extract_strided_slice %240 {offsets = [0, 96], sizes = [1, 32], strides = [1, 1]} : vector<1x128xf32> to vector<1x32xf32>
    %245 = arith.mulf %242, %227 : vector<1x32xf32>
    %246 = arith.mulf %241, %243 : vector<1x32xf32>
    %247 = arith.addf %245, %246 : vector<1x32xf32>
    %248 = math.tanh %247 : vector<1x32xf32>
    %249 = arith.mulf %244, %248 : vector<1x32xf32>
    %250 = arith.truncf %249 : vector<1x32xf32> to vector<1x32xbf16>
    %cst_44 = arith.constant dense<0.000000e+00> : vector<1x128xf32>
    %251 = tpu.matmul %250, %182, %cst_44 {dimension_numbers = #tpu.dot_dimension_numbers<[1], [0], [0], [1], [0, 0, 1, 1], [], []>} : vector<1x32xbf16>, vector<32x128xbf16>, vector<1x128xf32> -> vector<1x128xf32>
    %252 = vector.extract_strided_slice %187 {offsets = [3, 0], sizes = [1, 128], strides = [1, 1]} : vector<8x128xf32> to vector<1x128xf32>
    %253 = arith.addf %251, %252 : vector<1x128xf32>
    %254 = math.tanh %253 : vector<1x128xf32>
    %255 = arith.negf %253 : vector<1x128xf32>
    %256 = math.exp %255 : vector<1x128xf32>
    %cst_45 = arith.constant 1.000000e+00 : f32
    %257 = vector.broadcast %cst_45 : f32 to vector<1x128xf32>
    %258 = arith.addf %257, %256 : vector<1x128xf32>
    %259 = arith.divf %257, %258 : vector<1x128xf32>
    %260 = arith.select %5, %254, %259 : vector<1x128xi1>, vector<1x128xf32>
    %261 = vector.extract_strided_slice %260 {offsets = [0, 0], sizes = [1, 32], strides = [1, 1]} : vector<1x128xf32> to vector<1x32xf32>
    %262 = vector.extract_strided_slice %260 {offsets = [0, 32], sizes = [1, 32], strides = [1, 1]} : vector<1x128xf32> to vector<1x32xf32>
    %263 = vector.extract_strided_slice %260 {offsets = [0, 64], sizes = [1, 32], strides = [1, 1]} : vector<1x128xf32> to vector<1x32xf32>
    %264 = vector.extract_strided_slice %260 {offsets = [0, 96], sizes = [1, 32], strides = [1, 1]} : vector<1x128xf32> to vector<1x32xf32>
    %265 = arith.mulf %262, %247 : vector<1x32xf32>
    %266 = arith.mulf %261, %263 : vector<1x32xf32>
    %267 = arith.addf %265, %266 : vector<1x32xf32>
    %268 = math.tanh %267 : vector<1x32xf32>
    %269 = arith.mulf %264, %268 : vector<1x32xf32>
    %270 = arith.truncf %269 : vector<1x32xf32> to vector<1x32xbf16>
    %cst_46 = arith.constant dense<0.000000e+00> : vector<1x128xf32>
    %271 = tpu.matmul %270, %182, %cst_46 {dimension_numbers = #tpu.dot_dimension_numbers<[1], [0], [0], [1], [0, 0, 1, 1], [], []>} : vector<1x32xbf16>, vector<32x128xbf16>, vector<1x128xf32> -> vector<1x128xf32>
    %272 = vector.extract_strided_slice %187 {offsets = [4, 0], sizes = [1, 128], strides = [1, 1]} : vector<8x128xf32> to vector<1x128xf32>
    %273 = arith.addf %271, %272 : vector<1x128xf32>
    %274 = math.tanh %273 : vector<1x128xf32>
    %275 = arith.negf %273 : vector<1x128xf32>
    %276 = math.exp %275 : vector<1x128xf32>
    %cst_47 = arith.constant 1.000000e+00 : f32
    %277 = vector.broadcast %cst_47 : f32 to vector<1x128xf32>
    %278 = arith.addf %277, %276 : vector<1x128xf32>
    %279 = arith.divf %277, %278 : vector<1x128xf32>
    %280 = arith.select %5, %274, %279 : vector<1x128xi1>, vector<1x128xf32>
    %281 = vector.extract_strided_slice %280 {offsets = [0, 0], sizes = [1, 32], strides = [1, 1]} : vector<1x128xf32> to vector<1x32xf32>
    %282 = vector.extract_strided_slice %280 {offsets = [0, 32], sizes = [1, 32], strides = [1, 1]} : vector<1x128xf32> to vector<1x32xf32>
    %283 = vector.extract_strided_slice %280 {offsets = [0, 64], sizes = [1, 32], strides = [1, 1]} : vector<1x128xf32> to vector<1x32xf32>
    %284 = vector.extract_strided_slice %280 {offsets = [0, 96], sizes = [1, 32], strides = [1, 1]} : vector<1x128xf32> to vector<1x32xf32>
    %285 = arith.mulf %282, %267 : vector<1x32xf32>
    %286 = arith.mulf %281, %283 : vector<1x32xf32>
    %287 = arith.addf %285, %286 : vector<1x32xf32>
    %288 = math.tanh %287 : vector<1x32xf32>
    %289 = arith.mulf %284, %288 : vector<1x32xf32>
    %290 = arith.truncf %289 : vector<1x32xf32> to vector<1x32xbf16>
    %cst_48 = arith.constant dense<0.000000e+00> : vector<1x128xf32>
    %291 = tpu.matmul %290, %182, %cst_48 {dimension_numbers = #tpu.dot_dimension_numbers<[1], [0], [0], [1], [0, 0, 1, 1], [], []>} : vector<1x32xbf16>, vector<32x128xbf16>, vector<1x128xf32> -> vector<1x128xf32>
    %292 = vector.extract_strided_slice %187 {offsets = [5, 0], sizes = [1, 128], strides = [1, 1]} : vector<8x128xf32> to vector<1x128xf32>
    %293 = arith.addf %291, %292 : vector<1x128xf32>
    %294 = math.tanh %293 : vector<1x128xf32>
    %295 = arith.negf %293 : vector<1x128xf32>
    %296 = math.exp %295 : vector<1x128xf32>
    %cst_49 = arith.constant 1.000000e+00 : f32
    %297 = vector.broadcast %cst_49 : f32 to vector<1x128xf32>
    %298 = arith.addf %297, %296 : vector<1x128xf32>
    %299 = arith.divf %297, %298 : vector<1x128xf32>
    %300 = arith.select %5, %294, %299 : vector<1x128xi1>, vector<1x128xf32>
    %301 = vector.extract_strided_slice %300 {offsets = [0, 0], sizes = [1, 32], strides = [1, 1]} : vector<1x128xf32> to vector<1x32xf32>
    %302 = vector.extract_strided_slice %300 {offsets = [0, 32], sizes = [1, 32], strides = [1, 1]} : vector<1x128xf32> to vector<1x32xf32>
    %303 = vector.extract_strided_slice %300 {offsets = [0, 64], sizes = [1, 32], strides = [1, 1]} : vector<1x128xf32> to vector<1x32xf32>
    %304 = vector.extract_strided_slice %300 {offsets = [0, 96], sizes = [1, 32], strides = [1, 1]} : vector<1x128xf32> to vector<1x32xf32>
    %305 = arith.mulf %302, %287 : vector<1x32xf32>
    %306 = arith.mulf %301, %303 : vector<1x32xf32>
    %307 = arith.addf %305, %306 : vector<1x32xf32>
    %308 = math.tanh %307 : vector<1x32xf32>
    %309 = arith.mulf %304, %308 : vector<1x32xf32>
    %310 = arith.truncf %309 : vector<1x32xf32> to vector<1x32xbf16>
    %cst_50 = arith.constant dense<0.000000e+00> : vector<1x128xf32>
    %311 = tpu.matmul %310, %182, %cst_50 {dimension_numbers = #tpu.dot_dimension_numbers<[1], [0], [0], [1], [0, 0, 1, 1], [], []>} : vector<1x32xbf16>, vector<32x128xbf16>, vector<1x128xf32> -> vector<1x128xf32>
    %312 = vector.extract_strided_slice %187 {offsets = [6, 0], sizes = [1, 128], strides = [1, 1]} : vector<8x128xf32> to vector<1x128xf32>
    %313 = arith.addf %311, %312 : vector<1x128xf32>
    %314 = math.tanh %313 : vector<1x128xf32>
    %315 = arith.negf %313 : vector<1x128xf32>
    %316 = math.exp %315 : vector<1x128xf32>
    %cst_51 = arith.constant 1.000000e+00 : f32
    %317 = vector.broadcast %cst_51 : f32 to vector<1x128xf32>
    %318 = arith.addf %317, %316 : vector<1x128xf32>
    %319 = arith.divf %317, %318 : vector<1x128xf32>
    %320 = arith.select %5, %314, %319 : vector<1x128xi1>, vector<1x128xf32>
    %321 = vector.extract_strided_slice %320 {offsets = [0, 0], sizes = [1, 32], strides = [1, 1]} : vector<1x128xf32> to vector<1x32xf32>
    %322 = vector.extract_strided_slice %320 {offsets = [0, 32], sizes = [1, 32], strides = [1, 1]} : vector<1x128xf32> to vector<1x32xf32>
    %323 = vector.extract_strided_slice %320 {offsets = [0, 64], sizes = [1, 32], strides = [1, 1]} : vector<1x128xf32> to vector<1x32xf32>
    %324 = vector.extract_strided_slice %320 {offsets = [0, 96], sizes = [1, 32], strides = [1, 1]} : vector<1x128xf32> to vector<1x32xf32>
    %325 = arith.mulf %322, %307 : vector<1x32xf32>
    %326 = arith.mulf %321, %323 : vector<1x32xf32>
    %327 = arith.addf %325, %326 : vector<1x32xf32>
    %328 = math.tanh %327 : vector<1x32xf32>
    %329 = arith.mulf %324, %328 : vector<1x32xf32>
    %330 = arith.truncf %329 : vector<1x32xf32> to vector<1x32xbf16>
    %cst_52 = arith.constant dense<0.000000e+00> : vector<1x128xf32>
    %331 = tpu.matmul %330, %182, %cst_52 {dimension_numbers = #tpu.dot_dimension_numbers<[1], [0], [0], [1], [0, 0, 1, 1], [], []>} : vector<1x32xbf16>, vector<32x128xbf16>, vector<1x128xf32> -> vector<1x128xf32>
    %332 = vector.extract_strided_slice %187 {offsets = [7, 0], sizes = [1, 128], strides = [1, 1]} : vector<8x128xf32> to vector<1x128xf32>
    %333 = arith.addf %331, %332 : vector<1x128xf32>
    %334 = math.tanh %333 : vector<1x128xf32>
    %335 = arith.negf %333 : vector<1x128xf32>
    %336 = math.exp %335 : vector<1x128xf32>
    %cst_53 = arith.constant 1.000000e+00 : f32
    %337 = vector.broadcast %cst_53 : f32 to vector<1x128xf32>
    %338 = arith.addf %337, %336 : vector<1x128xf32>
    %339 = arith.divf %337, %338 : vector<1x128xf32>
    %340 = arith.select %5, %334, %339 : vector<1x128xi1>, vector<1x128xf32>
    %341 = vector.extract_strided_slice %340 {offsets = [0, 0], sizes = [1, 32], strides = [1, 1]} : vector<1x128xf32> to vector<1x32xf32>
    %342 = vector.extract_strided_slice %340 {offsets = [0, 32], sizes = [1, 32], strides = [1, 1]} : vector<1x128xf32> to vector<1x32xf32>
    %343 = vector.extract_strided_slice %340 {offsets = [0, 64], sizes = [1, 32], strides = [1, 1]} : vector<1x128xf32> to vector<1x32xf32>
    %344 = vector.extract_strided_slice %340 {offsets = [0, 96], sizes = [1, 32], strides = [1, 1]} : vector<1x128xf32> to vector<1x32xf32>
    %345 = arith.mulf %342, %327 : vector<1x32xf32>
    %346 = arith.mulf %341, %343 : vector<1x32xf32>
    %347 = arith.addf %345, %346 : vector<1x32xf32>
    %348 = math.tanh %347 : vector<1x32xf32>
    %349 = arith.mulf %344, %348 : vector<1x32xf32>
    %c0_54 = arith.constant 0 : index
    %c0_55 = arith.constant 0 : index
    %350 = vector.load %arg5[%c0_54, %c0_55] : memref<1x32xf32, #tpu.memory_space<vmem>>, vector<1x32xf32>
    tpu.vector_store %arg5[%c0_54, %c0_55], %349 {strides = array<i32>} : memref<1x32xf32, #tpu.memory_space<vmem>>, vector<1x32xf32>,
    return
  }
}

</mosaic_0001>

<bundles_post_ra>
// kernel: tpu_custom_call.1
= control target key start
LH: loop header
LB: loop body
LE: loop exit
PB: predicated region body
PF: predicated region fallthrough
CT: control target
= control target key end

     0   :  { %10 = vsyncpa [#allocation3], 0  ;;  %s2437_s0 = inlined_call_operand.hbm [shape: bf16[8,128], index: 0, kind: input, shape index: {}]   ;;  %s2438_s1 = inlined_call_operand.hbm [shape: bf16[128,128], index: 1, kind: input, shape index: {}]   ;;  %s2439_s2 = inlined_call_operand.hbm [shape: bf16[1,32,128], index: 2, kind: input, shape index: {}]   ;;  %s2440_s3 = inlined_call_operand.hbm [shape: bf16[2,32,128], index: 3, kind: input, shape index: {}]   ;;  %s2441_s4 = inlined_call_operand.vmem [shape: f32[2,1,128], index: 4, kind: input, shape index: {}]   ;;  %s2442_s5 = inlined_call_operand.hbm [shape: f32[1,32], index: 5, kind: output, shape index: {}]  }
   0x1   :  { %11 = vsyncpa [#allocation6], 0 }
   0x2   :  { %12 = vsyncpa [#allocation9], 0 }
   0x3   :  { %13 = vsyncpa [#allocation4], 0  ;;  %s2061_s18 = smov [#allocation5]   ;;  %s1943_s22 = scalar_lea.hbm %s2438_s1, 1024 }
   0x4   :  { %s29_s19 = sshll.u32 %s2061_s18, 4  ;;  %p1944_p0 = scmp.ne.s32.totalorder %s2438_s1, %s1943_s22  ;;  %s30_s19 = int_to_ptr.vmem [resolvable:$true] %s29_s19 }
   0x5   :  { %p1947_p1 = scmp.lt.u32.totalorder %s1943_s22, %s2438_s1 }
   0x7   :  { %p1949_p2 = pnand %p1947_p1, %p1944_p0 }
   0x9   :  { %1952 = shalt.err (!%p1949_p2)
}
   0xa   :  { %s1953_s27 = scalar_lea.vmem %s30_s19, 1024  ;;  %p1958_p4 = scmp.lt.s32.totalorder %s30_s19, %s30_s19 }
   0xb   :  { %p1954_p3 = scmp.ne.s32.totalorder %s30_s19, %s1953_s27  ;;  %p1959_p5 = scmp.lt.s32.totalorder %s1953_s27, %s1953_s27 }
   0xd   :  { %p1960_p6 = por %p1959_p5, %p1958_p4 }
   0xf   :  { %p1961_p7 = pnand %p1960_p6, %p1954_p3 }
  0x11   :  { %1964 = shalt.err (!%p1961_p7)
}
  0x12   :  { %s2062_s28 = smov 64   ;;  %s2063_s29 = smov 4  }
  0x13   :  { %35 = dma.hbm_to_vmem [thread:$0]  %s2438_s1, 1024, %s30_s19, [#allocation6], %s2062_s28, %s2062_s28, %s2063_s29  }
  0x14   :  { %s2064_s7 = smov [#allocation2]   ;;  %s2065_s9 = smov [#allocation7]  }
  0x15   :  { %s20_s8 = sshll.u32 %s2064_s7, 4  ;;  %s41_s10 = sshll.u32 %s2065_s9, 4  ;;  %s21_s8 = int_to_ptr.vmem [resolvable:$true] %s20_s8  ;;  %s42_s10 = int_to_ptr.vmem [resolvable:$true] %s41_s10 }
  0x16   :  { %s1965_s13 = scalar_lea.hbm %s2437_s0, 64 }
  0x17   :  { %p1966_p8 = scmp.ne.s32.totalorder %s2437_s0, %s1965_s13  ;;  %p1969_p9 = scmp.lt.u32.totalorder %s1965_s13, %s2437_s0 }
  0x19   :  { %p1971_p10 = pnand %p1969_p9, %p1966_p8 }
  0x1b   :  { %1974 = shalt.err (!%p1971_p10)
}
  0x1c   :  { %s1975_s1 = scalar_lea.vmem %s21_s8, 64  ;;  %p1980_p12 = scmp.lt.s32.totalorder %s21_s8, %s21_s8 }
  0x1d   :  { %p1976_p11 = scmp.ne.s32.totalorder %s21_s8, %s1975_s1  ;;  %p1981_p13 = scmp.lt.s32.totalorder %s1975_s1, %s1975_s1 }
  0x1f   :  { %p1982_p0 = por %p1981_p13, %p1980_p12 }
  0x21   :  { %p1983_p1 = pnand %p1982_p0, %p1976_p11 }
  0x23   :  { %1986 = shalt.err (!%p1983_p1)
}
  0x24   :  { %23 = dma.hbm_to_vmem [thread:$0]  %s2437_s0, 64, %s21_s8, [#allocation3]  }
  0x25   :  { %s1987_s22 = scalar_lea.hbm %s2439_s2, 256 }
  0x26   :  { %p1988_p2 = scmp.ne.s32.totalorder %s2439_s2, %s1987_s22  ;;  %p1991_p3 = scmp.lt.u32.totalorder %s1987_s22, %s2439_s2 }
  0x28   :  { %p1993_p4 = pnand %p1991_p3, %p1988_p2 }
  0x2a   :  { %1996 = shalt.err (!%p1993_p4)
}
  0x2b   :  { %s1997_s27 = scalar_lea.vmem %s42_s10, 256  ;;  %p2002_p6 = scmp.lt.s32.totalorder %s42_s10, %s42_s10 }
  0x2c   :  { %p1998_p5 = scmp.ne.s32.totalorder %s42_s10, %s1997_s27  ;;  %p2003_p7 = scmp.lt.s32.totalorder %s1997_s27, %s1997_s27 }
  0x2e   :  { %p2004_p8 = por %p2003_p7, %p2002_p6 }
  0x30   :  { %p2005_p9 = pnand %p2004_p8, %p1998_p5 }
  0x32   :  { %2008 = shalt.err (!%p2005_p9)
}
  0x33   :  { %47 = dma.hbm_to_vmem [thread:$0]  %s2439_s2, 256, %s42_s10, [#allocation6], %s2062_s28, %s2062_s28, %s2063_s29  }
  0x34   :  { %s2066_s6 = smov [#allocation8]   ;;  %s2009_s11 = scalar_lea.hbm %s2440_s3, 512 }
  0x35   :  { %s53_s7 = sshll.u32 %s2066_s6, 4  ;;  %p2010_p10 = scmp.ne.s32.totalorder %s2440_s3, %s2009_s11  ;;  %s54_s7 = int_to_ptr.vmem [resolvable:$true] %s53_s7 }
  0x36   :  { %p2013_p11 = scmp.lt.u32.totalorder %s2009_s11, %s2440_s3 }
  0x38   :  { %p2015_p12 = pnand %p2013_p11, %p2010_p10 }
  0x3a   :  { %2018 = shalt.err (!%p2015_p12)
}
  0x3b   :  { %s2019_s16 = scalar_lea.vmem %s54_s7, 512  ;;  %p2024_p0 = scmp.lt.s32.totalorder %s54_s7, %s54_s7 }
  0x3c   :  { %p2020_p13 = scmp.ne.s32.totalorder %s54_s7, %s2019_s16  ;;  %p2025_p1 = scmp.lt.s32.totalorder %s2019_s16, %s2019_s16 }
  0x3e   :  { %p2026_p2 = por %p2025_p1, %p2024_p0 }
  0x40   :  { %p2027_p3 = pnand %p2026_p2, %p2020_p13 }
  0x42   :  { %2030 = shalt.err (!%p2027_p3)
}
  0x43   :  { %59 = dma.hbm_to_vmem [thread:$0]  %s2440_s3, 512, %s54_s7, [#allocation9], %s2062_s28, %s2062_s28, %s2063_s29  }
  0x44   :  { %2053 = dma.done.wait [#allocation3], 64  }
  0x45   :  { %2054 = vsyncadd [#allocation3], 4294967232 }
  0x46   :  { %2055 = dma.done.wait [#allocation6], 1280  }
  0x47   :  { %2056 = vsyncadd [#allocation6], 4294966016 }
  0x48   :  { %2057 = dma.done.wait [#allocation9], 512  }
  0x49   :  { %2058 = vsyncadd [#allocation9], 4294966784  ;;  %v2067_v0 = vmov 0.0   ;;  %vm2068_vm0 = vmmov 0   ;;  %v1801_v1 = vld [vmem:[#allocation5] sm:$0xff]   ;;  %v1802_v2 = vld [vmem:[#allocation5 + $0x8] sm:$0xff]   ;;  %v75_v26 = vlaneseq }
  0x4a   :  { %1634 = vmatprep.subr.bf16.mxu0 %v2067_v0  ;;  %1654 = vmatprep.subr.bf16.mxu1 %v2067_v0  ;;  %v1803_v3 = vld [vmem:[#allocation5 + $0x10] sm:$0xff]   ;;  %v2170_v5 = vld [vmem:[#allocation8 + $0x8] sm:$0xff]   ;;  %v1805_v7 = vld [vmem:[#allocation5 + $0x20] sm:$0xff]   ;;  %v2069_v8 = vmov 0   ;;  %s2070_s17 = smov 32   ;;  %vm208_vm4 = vcmask 261120  }
  0x4b   :  { %1658 = vmatprep.mubr.msk.bf16.mxu1 %vm2068_vm0, %v2067_v0  ;;  %1650 = vmatprep.mubr.msk.bf16.mxu0 %vm2068_vm0, %v2067_v0  ;;  %v2166_v4 = vld [vmem:[#allocation8] sm:$0xff]   ;;  %v1804_v6 = vld [vmem:[#allocation5 + $0x18] sm:$0xff]   ;;  %v1806_v9 = vld [vmem:[#allocation5 + $0x28] sm:$0xff]   ;;  %v76_v28 = vand.u32 127, %v75_v26  ;;  %vm817_vm5 = vcmask 1040384   ;;  %vm819_vm6 = vcmask 1041408  }
  0x4c   :  { %1635 = vmatpush3.bf16.msra.mxu0 %v1801_v1  ;;  %1655 = vmatpush3.bf16.msra.mxu1 %v2166_v4  ;;  %v1808_v10 = vld [vmem:[#allocation5 + $0x30] sm:$0xff]   ;;  %v1810_v11 = vld [vmem:[#allocation5 + $0x38] sm:$0xff]   ;;  %vm821_vm7 = vcmask 1042432   ;;  %vm823_vm8 = vcmask 1043456   ;;  %vm825_vm9 = vcmask 1044480   ;;  %vm827_vm10 = vcmask 1045504  }
  0x4d   :  { %1636 = vmatprep.subr.bf16.mxu0 %v2067_v0  ;;  %1656 = vmatprep.subr.bf16.mxu1 %v2067_v0  ;;  %v80_v12 = vld [vmem:[#allocation2] sm:$0xf]  ;;  %vm77_vm1 = vcmp.ge.s32.totalorder %v76_v28, 64  ;;  %vm78_vm2 = vcmp.lt.s32.totalorder %v76_v28, 96  ;;  %vm829_vm11 = vcmask 1046528   ;;  %vm1507_vm12 = vcmask 253952  }
  0x4e   :  { %v1526_v17 = vld [vmem:[%s2441_s4] ss:$0 sm:$0xff]  ;;  %vm2200_vm3 = vmand %vm77_vm1, %vm78_vm2 }
  0x50   :  { %1637 = vmatpush3.bf16.msra.mxu0 %v1802_v2  ;;  %1657 = vmatpush3.bf16.msra.mxu1 %v2170_v5 }
  0x51   :  { %1638 = vmatprep.subr.bf16.mxu0 %v2067_v0  ;;  %1662 = vmatprep.subr.bf16.mxu1 %v2067_v0 }
  0x53   :  { %1659 = vmatmul.mubr.bf16.vlgmr.msra.gmra.mrb[0].mxu1 %v2069_v8 }
  0x54   :  { %1639 = vmatpush3.bf16.msra.mxu0 %v1803_v3  ;;  %1663 = vmatpush3.bf16.msra.mxu1 %v2166_v4 }
  0x55   :  { %1640 = vmatprep.subr.bf16.mxu0 %v2067_v0  ;;  %1666 = vmatprep.mubr.msk.bf16.mxu1 %vm2068_vm0, %v2067_v0 }
  0x56   :  { %1664 = vmatprep.subr.bf16.mxu1 %v2067_v0 }
  0x58   :  { %1641 = vmatpush3.bf16.msra.mxu0 %v1804_v6  ;;  %1665 = vmatpush3.bf16.msra.mxu1 %v2170_v5 }
  0x59   :  { %1642 = vmatprep.subr.bf16.mxu0 %v2067_v0  ;;  %1670 = vmatprep.subr.bf16.mxu1 %v2067_v0 }
  0x5c   :  { %1643 = vmatpush3.bf16.msra.mxu0 %v1805_v7 }
  0x5d   :  { %1644 = vmatprep.subr.bf16.mxu0 %v2067_v0 }
  0x60   :  { %1645 = vmatpush3.bf16.msra.mxu0 %v1806_v9 }
  0x61   :  { %1646 = vmatprep.subr.bf16.mxu0 %v2067_v0 }
  0x64   :  { %1647 = vmatpush3.bf16.msra.mxu0 %v1808_v10 }
  0x65   :  { %1648 = vmatprep.subr.bf16.mxu0 %v2067_v0 }
  0x68   :  { %1649 = vmatpush3.bf16.msra.mxu0 %v1810_v11 }
  0x69   :  { %1686 = vmatprep.subr.bf16.mxu0 %v2067_v0 }
  0x6b   :  { %1651 = vmatmul.mubr.bf16.vlgmr.msra.gmra.mrb[0].mxu0 %v80_v12 }
  0x6c   :  { %1687 = vmatpush3.bf16.msra.mxu0 %v2166_v4  ;;  %1690 = vmatprep.mubr.msk.bf16.mxu0 %vm2068_vm0, %v2067_v0 }
  0x6d   :  { %1688 = vmatprep.subr.bf16.mxu0 %v2067_v0 }
  0x70   :  { %1689 = vmatpush3.bf16.msra.mxu0 %v2170_v5 }
  0x71   :  { %1702 = vmatprep.subr.bf16.mxu0 %v2067_v0 }
 0x126   :  { %v246_v13 = vpop.f32.mrb[0].mxu1 }
 0x127   :  { %v1660_v14 = vpop.f32.mrb[1].mxu1 }
 0x128   :  { %v249_v15 = vpop.f32.mrb[2].mxu1 }
 0x129   :  { %v1661_v16 = vpop.f32.mrb[3].mxu1 }
 0x13e   :  { %v190_v18 = vpop.f32.mrb[0].mxu0 }
 0x13f   :  { %v2197_v19 = vadd.f32 %v1526_v17, %v190_v18  ;;  %v1652_v20 = vpop.f32.mrb[1].mxu0 }
 0x140   :  { %v193_v21 = vpop.f32.mrb[2].mxu0 }
 0x141   :  { %v1653_v22 = vpop.f32.mrb[3].mxu0  ;;  %v247_v23 = vadd.f32 %v246_v13, %v2197_v19  ;;  %v282_v43 = vrot.slane %v2197_v19, 1  ;;  %v356_v2 = vrot.slane %v2197_v19, 2 }
 0x143   :  { %v1537_v24 = vmul.f32 -1.442695, %v247_v23 }
 0x145   :  { %1815 = vpow2.f32 %v1537_v24 }
 0x146   :  { %1817 = vtanh.f32 %v247_v23 }
 0x14f   :  { %v1816_v25 = vpop.eup %1815 }
 0x150   :  { %v256_v27 = vadd.f32 1.0, %v1816_v25  ;;  %v1818_v30 = vpop.eup %1817 }
 0x152   :  { %1819 = vrcp.f32 %v256_v27 }
 0x15c   :  { %v1820_v31 = vpop.eup %1819 }
 0x15d   :  { %v259_v32 = vsel %vm2200_vm3, %v1818_v30, %v1820_v31 }
 0x15e   :  { %262 = vrot.lane.b32.xlu0 %v259_v32, %s2062_s28  ;;  %v260_v35 = vmul.f32 0.0, %v259_v32 }
 0x1d0   :  { %v263_v33 = vpop.permute.xlu0 %262 }
 0x1d1   :  { %v265_v34 = vmul.f32 %v263_v33, %v259_v32  ;;  %v430_v33 = vrot.slane %v2197_v19, 3 }
 0x1d3   :  { %267 = vrot.lane.b32.xlu0 %v265_v34, %s2070_s17 }
 0x245   :  { %v268_v36 = vpop.permute.xlu0 %267 }
 0x246   :  { %v270_v37 = vadd.f32 %v268_v36, %v260_v35 }
 0x248   :  { %1821 = vtanh.f32 %v270_v37 }
 0x252   :  { %v1822_v38 = vpop.eup %1821 }
 0x253   :  { %273 = vrot.lane.b32.xlu1 %v1822_v38, %s2062_s28 }
 0x2c5   :  { %v274_v39 = vpop.permute.xlu1 %273 }
 0x2c6   :  { %v2209_v40 = vmul.f32 %v274_v39, %v259_v32 }
 0x2c8   :  { %v277_v41 = vpack.c.bf16 %v2209_v40, %v2209_v40 }
 0x2ca   :  { %279 = vrot.lane.b32.xlu1 %v277_v41, %s2070_s17 }
 0x33c   :  { %v280_v42 = vpop.permute.xlu1 %279 }
 0x33d   :  { %1667 = vmatmul.mubr.msk.bf16.vlgmr.msra.gmra.mrb[4].mxu1 %vm208_vm4, %v280_v42 }
 0x33e   :  { %1671 = vmatpush3.bf16.msra.mxu1 %v2166_v4  ;;  %1674 = vmatprep.mubr.msk.bf16.mxu1 %vm2068_vm0, %v2067_v0 }
 0x33f   :  { %1672 = vmatprep.subr.bf16.mxu1 %v2067_v0 }
 0x342   :  { %1673 = vmatpush3.bf16.msra.mxu1 %v2170_v5 }
 0x343   :  { %1678 = vmatprep.subr.bf16.mxu1 %v2067_v0 }
 0x410   :  { %v321_v44 = vpop.f32.mrb[4].mxu1 }
 0x411   :  { %v322_v45 = vadd.f32 %v321_v44, %v282_v43  ;;  %v1668_v46 = vpop.f32.mrb[5].mxu1 }
 0x412   :  { %v324_v47 = vpop.f32.mrb[6].mxu1 }
 0x413   :  { %v1539_v48 = vmul.f32 -1.442695, %v322_v45  ;;  %v1669_v49 = vpop.f32.mrb[7].mxu1 }
 0x415   :  { %1823 = vpow2.f32 %v1539_v48 }
 0x416   :  { %1825 = vtanh.f32 %v322_v45 }
 0x41f   :  { %v1824_v50 = vpop.eup %1823 }
 0x420   :  { %v331_v51 = vadd.f32 1.0, %v1824_v50  ;;  %v1826_v52 = vpop.eup %1825 }
 0x422   :  { %1827 = vrcp.f32 %v331_v51 }
 0x42c   :  { %v1828_v53 = vpop.eup %1827 }
 0x42d   :  { %v334_v54 = vsel %vm2200_vm3, %v1826_v52, %v1828_v53 }
 0x42e   :  { %337 = vrot.lane.b32.xlu0 %v334_v54, %s2062_s28  ;;  %v335_v57 = vmul.f32 %v334_v54, %v270_v37 }
 0x4a0   :  { %v338_v55 = vpop.permute.xlu0 %337 }
 0x4a1   :  { %v340_v56 = vmul.f32 %v338_v55, %v334_v54 }
 0x4a3   :  { %342 = vrot.lane.b32.xlu1 %v340_v56, %s2070_s17 }
 0x515   :  { %v343_v58 = vpop.permute.xlu1 %342 }
 0x516   :  { %v345_v59 = vadd.f32 %v343_v58, %v335_v57  ;;  %v504_v57 = vrot.slane %v2197_v19, 4 }
 0x518   :  { %1829 = vtanh.f32 %v345_v59 }
 0x522   :  { %v1830_v60 = vpop.eup %1829 }
 0x523   :  { %348 = vrot.lane.b32.xlu0 %v1830_v60, %s2062_s28 }
 0x595   :  { %v349_v61 = vpop.permute.xlu0 %348 }
 0x596   :  { %v351_v62 = vmul.f32 %v349_v61, %v334_v54 }
 0x598   :  { %v352_v63 = vpack.c.bf16 %v351_v62, %v351_v62  ;;  %v797_v24 = vrot.slane %v351_v62, 7 }
 0x59a   :  { %354 = vrot.lane.b32.xlu1 %v352_v63, %s2070_s17  ;;  %v818_v30 = vsel %vm817_vm5, %v2209_v40, %v797_v24 }
 0x60c   :  { %v355_v1 = vpop.permute.xlu1 %354 }
 0x60d   :  { %1675 = vmatmul.mubr.msk.bf16.vlgmr.msra.gmra.mrb[8].mxu1 %vm208_vm4, %v355_v1 }
 0x60e   :  { %1679 = vmatpush3.bf16.msra.mxu1 %v2166_v4  ;;  %1682 = vmatprep.mubr.msk.bf16.mxu1 %vm2068_vm0, %v2067_v0 }
 0x60f   :  { %1680 = vmatprep.subr.bf16.mxu1 %v2067_v0 }
 0x612   :  { %1681 = vmatpush3.bf16.msra.mxu1 %v2170_v5 }
 0x613   :  { %1694 = vmatprep.subr.bf16.mxu1 %v2067_v0 }
 0x6e0   :  { %v395_v3 = vpop.f32.mrb[8].mxu1 }
 0x6e1   :  { %v396_v6 = vadd.f32 %v395_v3, %v356_v2  ;;  %v1676_v7 = vpop.f32.mrb[9].mxu1 }
 0x6e2   :  { %v398_v9 = vpop.f32.mrb[10].mxu1 }
 0x6e3   :  { %v1541_v10 = vmul.f32 -1.442695, %v396_v6  ;;  %v1677_v11 = vpop.f32.mrb[11].mxu1 }
 0x6e5   :  { %1831 = vpow2.f32 %v1541_v10 }
 0x6e6   :  { %1833 = vtanh.f32 %v396_v6 }
 0x6ef   :  { %v1832_v12 = vpop.eup %1831 }
 0x6f0   :  { %v405_v13 = vadd.f32 1.0, %v1832_v12  ;;  %v1834_v14 = vpop.eup %1833 }
 0x6f2   :  { %1835 = vrcp.f32 %v405_v13 }
 0x6fc   :  { %v1836_v15 = vpop.eup %1835 }
 0x6fd   :  { %v408_v16 = vsel %vm2200_vm3, %v1834_v14, %v1836_v15 }
 0x6fe   :  { %411 = vrot.lane.b32.xlu0 %v408_v16, %s2062_s28  ;;  %v409_v20 = vmul.f32 %v408_v16, %v345_v59 }
 0x770   :  { %v412_v17 = vpop.permute.xlu0 %411 }
 0x771   :  { %v414_v18 = vmul.f32 %v412_v17, %v408_v16 }
 0x773   :  { %416 = vrot.lane.b32.xlu1 %v414_v18, %s2070_s17 }
 0x7e5   :  { %v417_v21 = vpop.permute.xlu1 %416 }
 0x7e6   :  { %v419_v22 = vadd.f32 %v417_v21, %v409_v20 }
 0x7e8   :  { %1837 = vtanh.f32 %v419_v22 }
 0x7f2   :  { %v1838_v23 = vpop.eup %1837 }
 0x7f3   :  { %422 = vrot.lane.b32.xlu0 %v1838_v23, %s2062_s28 }
 0x865   :  { %v423_v25 = vpop.permute.xlu0 %422 }
 0x866   :  { %v425_v26 = vmul.f32 %v423_v25, %v408_v16 }
 0x868   :  { %v426_v27 = vpack.c.bf16 %v425_v26, %v425_v26  ;;  %v800_v28 = vrot.slane %v425_v26, 6 }
 0x86a   :  { %v820_v31 = vsel %vm819_vm6, %v818_v30, %v800_v28  ;;  %428 = vrot.lane.b32.xlu1 %v426_v27, %s2070_s17 }
 0x8dc   :  { %v429_v32 = vpop.permute.xlu1 %428 }
 0x8dd   :  { %1683 = vmatmul.mubr.msk.bf16.vlgmr.msra.gmra.mrb[12].mxu1 %vm208_vm4, %v429_v32 }
 0x8de   :  { %1695 = vmatpush3.bf16.msra.mxu1 %v2166_v4  ;;  %1698 = vmatprep.mubr.msk.bf16.mxu1 %vm2068_vm0, %v2067_v0 }
 0x8df   :  { %1696 = vmatprep.subr.bf16.mxu1 %v2067_v0 }
 0x8e2   :  { %1697 = vmatpush3.bf16.msra.mxu1 %v2170_v5 }
 0x8e3   :  { %1710 = vmatprep.subr.bf16.mxu1 %v2067_v0 }
 0x9b0   :  { %v469_v34 = vpop.f32.mrb[12].mxu1 }
 0x9b1   :  { %v470_v35 = vadd.f32 %v469_v34, %v430_v33  ;;  %v1684_v36 = vpop.f32.mrb[13].mxu1 }
 0x9b2   :  { %v472_v37 = vpop.f32.mrb[14].mxu1 }
 0x9b3   :  { %v1543_v38 = vmul.f32 -1.442695, %v470_v35  ;;  %v1685_v39 = vpop.f32.mrb[15].mxu1 }
 0x9b5   :  { %1839 = vpow2.f32 %v1543_v38 }
 0x9b6   :  { %1841 = vtanh.f32 %v470_v35 }
 0x9bf   :  { %v1840_v40 = vpop.eup %1839 }
 0x9c0   :  { %v479_v41 = vadd.f32 1.0, %v1840_v40  ;;  %v1842_v42 = vpop.eup %1841 }
 0x9c2   :  { %1843 = vrcp.f32 %v479_v41 }
 0x9cc   :  { %v1844_v43 = vpop.eup %1843 }
 0x9cd   :  { %v482_v44 = vsel %vm2200_vm3, %v1842_v42, %v1844_v43 }
 0x9ce   :  { %485 = vrot.lane.b32.xlu0 %v482_v44, %s2062_s28  ;;  %v483_v47 = vmul.f32 %v482_v44, %v419_v22  ;;  %v578_v22 = vrot.slane %v2197_v19, 5 }
 0xa40   :  { %v486_v45 = vpop.permute.xlu0 %485 }
 0xa41   :  { %v488_v46 = vmul.f32 %v486_v45, %v482_v44  ;;  %v652_v45 = vrot.slane %v2197_v19, 6 }
 0xa43   :  { %490 = vrot.lane.b32.xlu1 %v488_v46, %s2070_s17 }
 0xab5   :  { %v491_v48 = vpop.permute.xlu1 %490 }
 0xab6   :  { %v493_v49 = vadd.f32 %v491_v48, %v483_v47 }
 0xab8   :  { %1845 = vtanh.f32 %v493_v49 }
 0xac2   :  { %v1846_v50 = vpop.eup %1845 }
 0xac3   :  { %496 = vrot.lane.b32.xlu0 %v1846_v50, %s2062_s28 }
 0xb35   :  { %v497_v51 = vpop.permute.xlu0 %496 }
 0xb36   :  { %v499_v52 = vmul.f32 %v497_v51, %v482_v44 }
 0xb38   :  { %v500_v53 = vpack.c.bf16 %v499_v52, %v499_v52  ;;  %v803_v54 = vrot.slane %v499_v52, 5 }
 0xb3a   :  { %v822_v55 = vsel %vm821_vm7, %v820_v31, %v803_v54  ;;  %502 = vrot.lane.b32.xlu1 %v500_v53, %s2070_s17 }
 0xbac   :  { %v503_v56 = vpop.permute.xlu1 %502 }
 0xbad   :  { %1691 = vmatmul.mubr.msk.bf16.vlgmr.msra.gmra.mrb[4].mxu0 %vm208_vm4, %v503_v56 }
 0xbae   :  { %1703 = vmatpush3.bf16.msra.mxu0 %v2166_v4  ;;  %1706 = vmatprep.mubr.msk.bf16.mxu0 %vm2068_vm0, %v2067_v0 }
 0xbaf   :  { %1704 = vmatprep.subr.bf16.mxu0 %v2067_v0 }
 0xbb2   :  { %1705 = vmatpush3.bf16.msra.mxu0 %v2170_v5 }
 0xbb3   :  { %1718 = vmatprep.subr.bf16.mxu0 %v2067_v0 }
 0xc80   :  { %v543_v58 = vpop.f32.mrb[4].mxu0 }
 0xc81   :  { %v544_v59 = vadd.f32 %v543_v58, %v504_v57  ;;  %v1692_v60 = vpop.f32.mrb[5].mxu0 }
 0xc82   :  { %v546_v61 = vpop.f32.mrb[6].mxu0 }
 0xc83   :  { %v1545_v62 = vmul.f32 -1.442695, %v544_v59  ;;  %v1693_v63 = vpop.f32.mrb[7].mxu0 }
 0xc85   :  { %1847 = vpow2.f32 %v1545_v62 }
 0xc86   :  { %1849 = vtanh.f32 %v544_v59 }
 0xc8f   :  { %v1848_v1 = vpop.eup %1847 }
 0xc90   :  { %v553_v2 = vadd.f32 1.0, %v1848_v1  ;;  %v1850_v3 = vpop.eup %1849 }
 0xc92   :  { %1851 = vrcp.f32 %v553_v2 }
 0xc9c   :  { %v1852_v6 = vpop.eup %1851 }
 0xc9d   :  { %v556_v7 = vsel %vm2200_vm3, %v1850_v3, %v1852_v6 }
 0xc9e   :  { %559 = vrot.lane.b32.xlu0 %v556_v7, %s2062_s28  ;;  %v557_v11 = vmul.f32 %v556_v7, %v493_v49 }
 0xd10   :  { %v560_v9 = vpop.permute.xlu0 %559 }
 0xd11   :  { %v562_v10 = vmul.f32 %v560_v9, %v556_v7  ;;  %v726_v9 = vrot.slane %v2197_v19, 7 }
 0xd13   :  { %564 = vrot.lane.b32.xlu1 %v562_v10, %s2070_s17 }
 0xd85   :  { %v565_v12 = vpop.permute.xlu1 %564 }
 0xd86   :  { %v567_v13 = vadd.f32 %v565_v12, %v557_v11 }
 0xd88   :  { %1853 = vtanh.f32 %v567_v13 }
 0xd92   :  { %v1854_v14 = vpop.eup %1853 }
 0xd93   :  { %570 = vrot.lane.b32.xlu0 %v1854_v14, %s2062_s28 }
 0xe05   :  { %v571_v15 = vpop.permute.xlu0 %570 }
 0xe06   :  { %v573_v16 = vmul.f32 %v571_v15, %v556_v7 }
 0xe08   :  { %v574_v17 = vpack.c.bf16 %v573_v16, %v573_v16  ;;  %v806_v18 = vrot.slane %v573_v16, 4 }
 0xe0a   :  { %v824_v20 = vsel %vm823_vm8, %v822_v55, %v806_v18  ;;  %576 = vrot.lane.b32.xlu1 %v574_v17, %s2070_s17 }
 0xe7c   :  { %v577_v21 = vpop.permute.xlu1 %576 }
 0xe7d   :  { %1699 = vmatmul.mubr.msk.bf16.vlgmr.msra.gmra.mrb[16].mxu1 %vm208_vm4, %v577_v21 }
 0xe7e   :  { %1711 = vmatpush3.bf16.msra.mxu1 %v2166_v4  ;;  %1714 = vmatprep.mubr.msk.bf16.mxu1 %vm2068_vm0, %v2067_v0 }
 0xe7f   :  { %1712 = vmatprep.subr.bf16.mxu1 %v2067_v0 }
 0xe82   :  { %1713 = vmatpush3.bf16.msra.mxu1 %v2170_v5 }
 0xe83   :  { %1726 = vmatprep.subr.bf16.mxu1 %v2067_v0 }
 0xf50   :  { %v617_v23 = vpop.f32.mrb[16].mxu1 }
 0xf51   :  { %v618_v24 = vadd.f32 %v617_v23, %v578_v22  ;;  %v1700_v25 = vpop.f32.mrb[17].mxu1 }
 0xf52   :  { %v620_v26 = vpop.f32.mrb[18].mxu1 }
 0xf53   :  { %v1547_v27 = vmul.f32 -1.442695, %v618_v24  ;;  %v1701_v28 = vpop.f32.mrb[19].mxu1  ;;  %v1811_v26 = vld [vmem:[#allocation7] sm:$0xff]  }
 0xf54   :  { %v1813_v28 = vld [vmem:[#allocation7 + $0x8] sm:$0xff]  }
 0xf55   :  { %1855 = vpow2.f32 %v1547_v27  ;;  %v2303_v27 = vld [vmem:[#allocation8 + $0x10] sm:$0xff]  }
 0xf56   :  { %1857 = vtanh.f32 %v618_v24 }
 0xf5f   :  { %v1856_v30 = vpop.eup %1855 }
 0xf60   :  { %v627_v4 = vadd.f32 1.0, %v1856_v30  ;;  %v1858_v31 = vpop.eup %1857  ;;  %v2308_v30 = vld [vmem:[#allocation8 + $0x18] sm:$0xff]  }
 0xf62   :  { %1859 = vrcp.f32 %v627_v4 }
 0xf6c   :  { %v1860_v32 = vpop.eup %1859 }
 0xf6d   :  { %v630_v5 = vsel %vm2200_vm3, %v1858_v31, %v1860_v32 }
 0xf6e   :  { %633 = vrot.lane.b32.xlu0 %v630_v5, %s2062_s28  ;;  %v631_v35 = vmul.f32 %v630_v5, %v567_v13 }
 0xfe0   :  { %v634_v33 = vpop.permute.xlu0 %633 }
 0xfe1   :  { %v636_v34 = vmul.f32 %v634_v33, %v630_v5 }
 0xfe3   :  { %638 = vrot.lane.b32.xlu1 %v636_v34, %s2070_s17 }
0x1055   :  { %v639_v36 = vpop.permute.xlu1 %638 }
0x1056   :  { %v641_v37 = vadd.f32 %v639_v36, %v631_v35 }
0x1058   :  { %1861 = vtanh.f32 %v641_v37 }
0x1062   :  { %v1862_v38 = vpop.eup %1861 }
0x1063   :  { %644 = vrot.lane.b32.xlu0 %v1862_v38, %s2062_s28 }
0x10d5   :  { %v645_v39 = vpop.permute.xlu0 %644 }
0x10d6   :  { %v647_v40 = vmul.f32 %v645_v39, %v630_v5  ;;  %v1553_v39 = vld [vmem:[%s2441_s4 + $0x1] ss:$0 sm:$0xff]  ;;  %s2071_s4 = smov [#allocation10]  }
0x10d7   :  { %s1515_s19 = sshll.u32 %s2071_s4, 4  ;;  %s1516_s19 = int_to_ptr.vmem [resolvable:$true] %s1515_s19 }
0x10d8   :  { %v648_v41 = vpack.c.bf16 %v647_v40, %v647_v40  ;;  %v809_v42 = vrot.slane %v647_v40, 3  ;;  %s2031_s20 = scalar_lea.vmem %s1516_s19, 16  ;;  %s2035_s21 = scalar_lea.vmem %s1516_s19, 32 }
0x10d9   :  { %p2032_p4 = scmp.ne.s32.totalorder %s1516_s19, %s2031_s20  ;;  %p2036_p5 = scmp.lt.s32.totalorder %s1516_s19, %s1516_s19 }
0x10da   :  { %v826_v43 = vsel %vm825_vm9, %v824_v20, %v809_v42  ;;  %650 = vrot.lane.b32.xlu1 %v648_v41, %s2070_s17  ;;  %p2037_p6 = scmp.lt.s32.totalorder %s2035_s21, %s2031_s20 }
0x10dc   :  { %p2038_p7 = por %p2037_p6, %p2036_p5 }
0x10de   :  { %p2039_p8 = pnand %p2038_p7, %p2032_p4 }
0x114c   :  { %v651_v44 = vpop.permute.xlu1 %650 }
0x114d   :  { %1707 = vmatmul.mubr.msk.bf16.vlgmr.msra.gmra.mrb[8].mxu0 %vm208_vm4, %v651_v44 }
0x114e   :  { %1722 = vmatprep.mubr.msk.bf16.mxu0 %vm2068_vm0, %v2067_v0  ;;  %1719 = vmatpush3.bf16.msra.mxu0 %v1811_v26 }
0x114f   :  { %1720 = vmatprep.subr.bf16.mxu0 %v2067_v0 }
0x1152   :  { %1721 = vmatpush3.bf16.msra.mxu0 %v1813_v28 }
0x1153   :  { %1734 = vmatprep.subr.bf16.mxu0 %v2067_v0 }
0x1220   :  { %v691_v46 = vpop.f32.mrb[8].mxu0 }
0x1221   :  { %v692_v47 = vadd.f32 %v691_v46, %v652_v45  ;;  %v1708_v48 = vpop.f32.mrb[9].mxu0 }
0x1222   :  { %v694_v49 = vpop.f32.mrb[10].mxu0 }
0x1223   :  { %v1549_v50 = vmul.f32 -1.442695, %v692_v47  ;;  %v1709_v51 = vpop.f32.mrb[11].mxu0 }
0x1225   :  { %1863 = vpow2.f32 %v1549_v50 }
0x1226   :  { %1865 = vtanh.f32 %v692_v47 }
0x122f   :  { %v1864_v52 = vpop.eup %1863 }
0x1230   :  { %v701_v53 = vadd.f32 1.0, %v1864_v52  ;;  %v1866_v54 = vpop.eup %1865 }
0x1232   :  { %1867 = vrcp.f32 %v701_v53 }
0x123c   :  { %v1868_v55 = vpop.eup %1867 }
0x123d   :  { %v704_v56 = vsel %vm2200_vm3, %v1866_v54, %v1868_v55 }
0x123e   :  { %707 = vrot.lane.b32.xlu0 %v704_v56, %s2062_s28  ;;  %v705_v59 = vmul.f32 %v704_v56, %v641_v37 }
0x12b0   :  { %v708_v57 = vpop.permute.xlu0 %707 }
0x12b1   :  { %v710_v58 = vmul.f32 %v708_v57, %v704_v56 }
0x12b3   :  { %712 = vrot.lane.b32.xlu1 %v710_v58, %s2070_s17 }
0x1325   :  { %v713_v60 = vpop.permute.xlu1 %712 }
0x1326   :  { %v715_v61 = vadd.f32 %v713_v60, %v705_v59 }
0x1328   :  { %1869 = vtanh.f32 %v715_v61 }
0x1332   :  { %v1870_v62 = vpop.eup %1869 }
0x1333   :  { %718 = vrot.lane.b32.xlu0 %v1870_v62, %s2062_s28 }
0x13a5   :  { %v719_v63 = vpop.permute.xlu0 %718 }
0x13a6   :  { %v721_v1 = vmul.f32 %v719_v63, %v704_v56 }
0x13a8   :  { %v722_v2 = vpack.c.bf16 %v721_v1, %v721_v1  ;;  %v812_v3 = vrot.slane %v721_v1, 2 }
0x13aa   :  { %724 = vrot.lane.b32.xlu1 %v722_v2, %s2070_s17  ;;  %v828_v6 = vsel %vm827_vm10, %v826_v43, %v812_v3 }
0x141c   :  { %v725_v7 = vpop.permute.xlu1 %724 }
0x141d   :  { %1715 = vmatmul.mubr.msk.bf16.vlgmr.msra.gmra.mrb[20].mxu1 %vm208_vm4, %v725_v7 }
0x141e   :  { %1730 = vmatprep.mubr.msk.bf16.mxu1 %vm2068_vm0, %v2067_v0  ;;  %1727 = vmatpush3.bf16.msra.mxu1 %v2303_v27 }
0x141f   :  { %1728 = vmatprep.subr.bf16.mxu1 %v2067_v0 }
0x1422   :  { %1729 = vmatpush3.bf16.msra.mxu1 %v2308_v30 }
0x1423   :  { %1742 = vmatprep.subr.bf16.mxu1 %v2067_v0 }
0x1425   :  { %1731 = vmatmul.mubr.bf16.vlgmr.msra.gmra.mrb[24].mxu1 %v2069_v8 }
0x1426   :  { %1743 = vmatpush3.bf16.msra.mxu1 %v2303_v27  ;;  %1746 = vmatprep.mubr.msk.bf16.mxu1 %vm2068_vm0, %v2067_v0 }
0x1427   :  { %1744 = vmatprep.subr.bf16.mxu1 %v2067_v0 }
0x142a   :  { %1745 = vmatpush3.bf16.msra.mxu1 %v2308_v30 }
0x142b   :  { %1758 = vmatprep.subr.bf16.mxu1 %v2067_v0 }
0x14f0   :  { %v765_v10 = vpop.f32.mrb[20].mxu1 }
0x14f1   :  { %v766_v11 = vadd.f32 %v765_v10, %v726_v9  ;;  %v1716_v12 = vpop.f32.mrb[21].mxu1 }
0x14f2   :  { %v768_v13 = vpop.f32.mrb[22].mxu1 }
0x14f3   :  { %v1551_v14 = vmul.f32 -1.442695, %v766_v11  ;;  %v1717_v15 = vpop.f32.mrb[23].mxu1 }
0x14f5   :  { %1871 = vpow2.f32 %v1551_v14 }
0x14f6   :  { %1873 = vtanh.f32 %v766_v11 }
0x14f8   :  { %v953_v8 = vpop.f32.mrb[24].mxu1 }
0x14f9   :  { %v1732_v35 = vpop.f32.mrb[25].mxu1 }
0x14fa   :  { %v956_v36 = vpop.f32.mrb[26].mxu1 }
0x14fb   :  { %v1733_v37 = vpop.f32.mrb[27].mxu1 }
0x14ff   :  { %v1872_v16 = vpop.eup %1871 }
0x1500   :  { %v775_v17 = vadd.f32 1.0, %v1872_v16  ;;  %v1874_v18 = vpop.eup %1873 }
0x1502   :  { %1875 = vrcp.f32 %v775_v17 }
0x150c   :  { %v1876_v20 = vpop.eup %1875 }
0x150d   :  { %v778_v21 = vsel %vm2200_vm3, %v1874_v18, %v1876_v20 }
0x150e   :  { %781 = vrot.lane.b32.xlu0 %v778_v21, %s2062_s28  ;;  %v779_v23 = vmul.f32 %v778_v21, %v715_v61 }
0x1580   :  { %v782_v22 = vpop.permute.xlu0 %781 }
0x1581   :  { %v784_v19 = vmul.f32 %v782_v22, %v778_v21 }
0x1583   :  { %786 = vrot.lane.b32.xlu1 %v784_v19, %s2070_s17 }
0x15f5   :  { %v787_v24 = vpop.permute.xlu1 %786 }
0x15f6   :  { %v789_v25 = vadd.f32 %v787_v24, %v779_v23 }
0x15f8   :  { %1877 = vtanh.f32 %v789_v25 }
0x1602   :  { %v1878_v4 = vpop.eup %1877 }
0x1603   :  { %792 = vrot.lane.b32.xlu0 %v1878_v4, %s2062_s28 }
0x1675   :  { %v793_v31 = vpop.permute.xlu0 %792 }
0x1676   :  { %v795_v32 = vmul.f32 %v793_v31, %v778_v21 }
0x1678   :  { %v815_v5 = vrot.slane %v795_v32, 1 }
0x167a   :  { %v830_v33 = vsel %vm829_vm11, %v828_v6, %v815_v5 }
0x167b   :  { %v831_v34 = vpack.c.bf16 %v830_v33, %v830_v33 }
0x167d   :  { %850 = vrot.lane.b32.xlu1 %v831_v34, %s2070_s17 }
0x16ef   :  { %v851_v38 = vpop.permute.xlu1 %850 }
0x16f0   :  { %1723 = vmatmul.mubr.msk.bf16.vlgmr.msra.gmra.mrb[12].mxu0 %vm208_vm4, %v851_v38 }
0x16f1   :  { %1735 = vmatpush3.bf16.msra.mxu0 %v2303_v27  ;;  %1738 = vmatprep.mubr.msk.bf16.mxu0 %vm2068_vm0, %v2067_v0 }
0x16f2   :  { %1736 = vmatprep.subr.bf16.mxu0 %v2067_v0 }
0x16f5   :  { %1737 = vmatpush3.bf16.msra.mxu0 %v2308_v30 }
0x16f6   :  { %1750 = vmatprep.subr.bf16.mxu0 %v2067_v0 }
0x17c3   :  { %v901_v40 = vpop.f32.mrb[12].mxu0 }
0x17c4   :  { %v2332_v41 = vadd.f32 %v1553_v39, %v901_v40  ;;  %v1724_v42 = vpop.f32.mrb[13].mxu0 }
0x17c5   :  { %v904_v43 = vpop.f32.mrb[14].mxu0 }
0x17c6   :  { %v1725_v44 = vpop.f32.mrb[15].mxu0  ;;  %v954_v45 = vadd.f32 %v953_v8, %v2332_v41  ;;  %v989_v62 = vrot.slane %v2332_v41, 1  ;;  %v1063_v24 = vrot.slane %v2332_v41, 2 }
0x17c8   :  { %v1559_v46 = vmul.f32 -1.442695, %v954_v45 }
0x17ca   :  { %1879 = vpow2.f32 %v1559_v46 }
0x17cb   :  { %1881 = vtanh.f32 %v954_v45 }
0x17d4   :  { %v1880_v47 = vpop.eup %1879 }
0x17d5   :  { %v963_v48 = vadd.f32 1.0, %v1880_v47  ;;  %v1882_v49 = vpop.eup %1881  ;;  %v1137_v47 = vrot.slane %v2332_v41, 3 }
0x17d7   :  { %1883 = vrcp.f32 %v963_v48 }
0x17e1   :  { %v1884_v50 = vpop.eup %1883 }
0x17e2   :  { %v966_v51 = vsel %vm2200_vm3, %v1882_v49, %v1884_v50 }
0x17e3   :  { %969 = vrot.lane.b32.xlu0 %v966_v51, %s2062_s28  ;;  %v967_v54 = vmul.f32 0.0, %v966_v51 }
0x1855   :  { %v970_v52 = vpop.permute.xlu0 %969 }
0x1856   :  { %v972_v53 = vmul.f32 %v970_v52, %v966_v51 }
0x1858   :  { %974 = vrot.lane.b32.xlu1 %v972_v53, %s2070_s17 }
0x18ca   :  { %v975_v55 = vpop.permute.xlu1 %974 }
0x18cb   :  { %v977_v56 = vadd.f32 %v975_v55, %v967_v54 }
0x18cd   :  { %1885 = vtanh.f32 %v977_v56 }
0x18d7   :  { %v1886_v57 = vpop.eup %1885 }
0x18d8   :  { %980 = vrot.lane.b32.xlu0 %v1886_v57, %s2062_s28 }
0x194a   :  { %v981_v58 = vpop.permute.xlu0 %980 }
0x194b   :  { %v983_v59 = vmul.f32 %v981_v58, %v966_v51 }
0x194d   :  { %v984_v60 = vpack.c.bf16 %v983_v59, %v983_v59 }
0x194f   :  { %986 = vrot.lane.b32.xlu1 %v984_v60, %s2070_s17 }
0x19c1   :  { %v987_v61 = vpop.permute.xlu1 %986 }
0x19c2   :  { %1739 = vmatmul.mubr.msk.bf16.vlgmr.msra.gmra.mrb[16].mxu0 %vm208_vm4, %v987_v61 }
0x19c3   :  { %1751 = vmatpush3.bf16.msra.mxu0 %v2303_v27  ;;  %1754 = vmatprep.mubr.msk.bf16.mxu0 %vm2068_vm0, %v2067_v0 }
0x19c4   :  { %1752 = vmatprep.subr.bf16.mxu0 %v2067_v0 }
0x19c7   :  { %1753 = vmatpush3.bf16.msra.mxu0 %v2308_v30 }
0x19c8   :  { %1766 = vmatprep.subr.bf16.mxu0 %v2067_v0 }
0x1a95   :  { %v1028_v63 = vpop.f32.mrb[16].mxu0 }
0x1a96   :  { %v1029_v1 = vadd.f32 %v1028_v63, %v989_v62  ;;  %v1740_v2 = vpop.f32.mrb[17].mxu0 }
0x1a97   :  { %v1031_v3 = vpop.f32.mrb[18].mxu0 }
0x1a98   :  { %v1561_v6 = vmul.f32 -1.442695, %v1029_v1  ;;  %v1741_v7 = vpop.f32.mrb[19].mxu0 }
0x1a9a   :  { %1887 = vpow2.f32 %v1561_v6 }
0x1a9b   :  { %1889 = vtanh.f32 %v1029_v1 }
0x1aa4   :  { %v1888_v9 = vpop.eup %1887 }
0x1aa5   :  { %v1038_v10 = vadd.f32 1.0, %v1888_v9  ;;  %v1890_v11 = vpop.eup %1889  ;;  %v1211_v9 = vrot.slane %v2332_v41, 4 }
0x1aa7   :  { %1891 = vrcp.f32 %v1038_v10 }
0x1ab1   :  { %v1892_v12 = vpop.eup %1891 }
0x1ab2   :  { %v1041_v13 = vsel %vm2200_vm3, %v1890_v11, %v1892_v12 }
0x1ab3   :  { %1044 = vrot.lane.b32.xlu0 %v1041_v13, %s2062_s28  ;;  %v1042_v16 = vmul.f32 %v1041_v13, %v977_v56 }
0x1b25   :  { %v1045_v14 = vpop.permute.xlu0 %1044 }
0x1b26   :  { %v1047_v15 = vmul.f32 %v1045_v14, %v1041_v13 }
0x1b28   :  { %1049 = vrot.lane.b32.xlu1 %v1047_v15, %s2070_s17 }
0x1b9a   :  { %v1050_v17 = vpop.permute.xlu1 %1049 }
0x1b9b   :  { %v1052_v18 = vadd.f32 %v1050_v17, %v1042_v16 }
0x1b9d   :  { %1893 = vtanh.f32 %v1052_v18 }
0x1ba7   :  { %v1894_v20 = vpop.eup %1893 }
0x1ba8   :  { %1055 = vrot.lane.b32.xlu0 %v1894_v20, %s2062_s28 }
0x1c1a   :  { %v1056_v21 = vpop.permute.xlu0 %1055 }
0x1c1b   :  { %v1058_v22 = vmul.f32 %v1056_v21, %v1041_v13 }
0x1c1d   :  { %v1059_v19 = vpack.c.bf16 %v1058_v22, %v1058_v22 }
0x1c1f   :  { %1061 = vrot.lane.b32.xlu1 %v1059_v19, %s2070_s17 }
0x1c91   :  { %v1062_v23 = vpop.permute.xlu1 %1061 }
0x1c92   :  { %1747 = vmatmul.mubr.msk.bf16.vlgmr.msra.gmra.mrb[28].mxu1 %vm208_vm4, %v1062_v23 }
0x1c93   :  { %1759 = vmatpush3.bf16.msra.mxu1 %v2303_v27  ;;  %1762 = vmatprep.mubr.msk.bf16.mxu1 %vm2068_vm0, %v2067_v0 }
0x1c94   :  { %1760 = vmatprep.subr.bf16.mxu1 %v2067_v0 }
0x1c97   :  { %1761 = vmatpush3.bf16.msra.mxu1 %v2308_v30 }
0x1c98   :  { %1774 = vmatprep.subr.bf16.mxu1 %v2067_v0 }
0x1d65   :  { %v1102_v25 = vpop.f32.mrb[28].mxu1 }
0x1d66   :  { %v1103_v26 = vadd.f32 %v1102_v25, %v1063_v24  ;;  %v1748_v28 = vpop.f32.mrb[29].mxu1 }
0x1d67   :  { %v1105_v4 = vpop.f32.mrb[30].mxu1 }
0x1d68   :  { %v1563_v31 = vmul.f32 -1.442695, %v1103_v26  ;;  %v1749_v32 = vpop.f32.mrb[31].mxu1 }
0x1d6a   :  { %1895 = vpow2.f32 %v1563_v31 }
0x1d6b   :  { %1897 = vtanh.f32 %v1103_v26 }
0x1d74   :  { %v1896_v5 = vpop.eup %1895 }
0x1d75   :  { %v1112_v33 = vadd.f32 1.0, %v1896_v5  ;;  %v1898_v34 = vpop.eup %1897  ;;  %v1285_v5 = vrot.slane %v2332_v41, 5 }
0x1d77   :  { %1899 = vrcp.f32 %v1112_v33 }
0x1d81   :  { %v1900_v8 = vpop.eup %1899 }
0x1d82   :  { %v1115_v35 = vsel %vm2200_vm3, %v1898_v34, %v1900_v8 }
0x1d83   :  { %1118 = vrot.lane.b32.xlu0 %v1115_v35, %s2062_s28  ;;  %v1116_v38 = vmul.f32 %v1115_v35, %v1052_v18 }
0x1df5   :  { %v1119_v36 = vpop.permute.xlu0 %1118 }
0x1df6   :  { %v1121_v37 = vmul.f32 %v1119_v36, %v1115_v35 }
0x1df8   :  { %1123 = vrot.lane.b32.xlu1 %v1121_v37, %s2070_s17 }
0x1e6a   :  { %v1124_v39 = vpop.permute.xlu1 %1123 }
0x1e6b   :  { %v1126_v40 = vadd.f32 %v1124_v39, %v1116_v38 }
0x1e6d   :  { %1901 = vtanh.f32 %v1126_v40 }
0x1e77   :  { %v1902_v42 = vpop.eup %1901 }
0x1e78   :  { %1129 = vrot.lane.b32.xlu0 %v1902_v42, %s2062_s28 }
0x1eea   :  { %v1130_v43 = vpop.permute.xlu0 %1129 }
0x1eeb   :  { %v1132_v44 = vmul.f32 %v1130_v43, %v1115_v35 }
0x1eed   :  { %v1133_v45 = vpack.c.bf16 %v1132_v44, %v1132_v44 }
0x1eef   :  { %1135 = vrot.lane.b32.xlu1 %v1133_v45, %s2070_s17 }
0x1f61   :  { %v1136_v46 = vpop.permute.xlu1 %1135 }
0x1f62   :  { %1755 = vmatmul.mubr.msk.bf16.vlgmr.msra.gmra.mrb[20].mxu0 %vm208_vm4, %v1136_v46 }
0x1f63   :  { %1767 = vmatpush3.bf16.msra.mxu0 %v2303_v27  ;;  %1770 = vmatprep.mubr.msk.bf16.mxu0 %vm2068_vm0, %v2067_v0 }
0x1f64   :  { %1768 = vmatprep.subr.bf16.mxu0 %v2067_v0 }
0x1f67   :  { %1769 = vmatpush3.bf16.msra.mxu0 %v2308_v30 }
0x1f68   :  { %1782 = vmatprep.subr.bf16.mxu0 %v2067_v0 }
0x2035   :  { %v1176_v48 = vpop.f32.mrb[20].mxu0 }
0x2036   :  { %v1177_v49 = vadd.f32 %v1176_v48, %v1137_v47  ;;  %v1756_v50 = vpop.f32.mrb[21].mxu0 }
0x2037   :  { %v1179_v51 = vpop.f32.mrb[22].mxu0 }
0x2038   :  { %v1565_v52 = vmul.f32 -1.442695, %v1177_v49  ;;  %v1757_v53 = vpop.f32.mrb[23].mxu0  ;;  %v1359_v51 = vrot.slane %v2332_v41, 6 }
0x203a   :  { %1903 = vpow2.f32 %v1565_v52 }
0x203b   :  { %1905 = vtanh.f32 %v1177_v49 }
0x2044   :  { %v1904_v54 = vpop.eup %1903 }
0x2045   :  { %v1186_v55 = vadd.f32 1.0, %v1904_v54  ;;  %v1906_v56 = vpop.eup %1905 }
0x2047   :  { %1907 = vrcp.f32 %v1186_v55 }
0x2051   :  { %v1908_v57 = vpop.eup %1907 }
0x2052   :  { %v1189_v58 = vsel %vm2200_vm3, %v1906_v56, %v1908_v57 }
0x2053   :  { %1192 = vrot.lane.b32.xlu0 %v1189_v58, %s2062_s28  ;;  %v1190_v61 = vmul.f32 %v1189_v58, %v1126_v40 }
0x20c5   :  { %v1193_v59 = vpop.permute.xlu0 %1192 }
0x20c6   :  { %v1195_v60 = vmul.f32 %v1193_v59, %v1189_v58 }
0x20c8   :  { %1197 = vrot.lane.b32.xlu1 %v1195_v60, %s2070_s17 }
0x213a   :  { %v1198_v62 = vpop.permute.xlu1 %1197 }
0x213b   :  { %v1200_v63 = vadd.f32 %v1198_v62, %v1190_v61 }
0x213d   :  { %1909 = vtanh.f32 %v1200_v63 }
0x2147   :  { %v1910_v1 = vpop.eup %1909 }
0x2148   :  { %1203 = vrot.lane.b32.xlu0 %v1910_v1, %s2062_s28 }
0x21ba   :  { %v1204_v2 = vpop.permute.xlu0 %1203 }
0x21bb   :  { %v1206_v3 = vmul.f32 %v1204_v2, %v1189_v58 }
0x21bd   :  { %v1207_v6 = vpack.c.bf16 %v1206_v3, %v1206_v3 }
0x21bf   :  { %1209 = vrot.lane.b32.xlu1 %v1207_v6, %s2070_s17 }
0x2231   :  { %v1210_v7 = vpop.permute.xlu1 %1209 }
0x2232   :  { %1763 = vmatmul.mubr.msk.bf16.vlgmr.msra.gmra.mrb[32].mxu1 %vm208_vm4, %v1210_v7 }
0x2233   :  { %1775 = vmatpush3.bf16.msra.mxu1 %v2303_v27  ;;  %1778 = vmatprep.mubr.msk.bf16.mxu1 %vm2068_vm0, %v2067_v0 }
0x2234   :  { %1776 = vmatprep.subr.bf16.mxu1 %v2067_v0 }
0x2237   :  { %1777 = vmatpush3.bf16.msra.mxu1 %v2308_v30 }
0x2305   :  { %v1250_v10 = vpop.f32.mrb[32].mxu1 }
0x2306   :  { %v1251_v11 = vadd.f32 %v1250_v10, %v1211_v9  ;;  %v1764_v12 = vpop.f32.mrb[33].mxu1 }
0x2307   :  { %v1253_v13 = vpop.f32.mrb[34].mxu1 }
0x2308   :  { %v1567_v14 = vmul.f32 -1.442695, %v1251_v11  ;;  %v1765_v15 = vpop.f32.mrb[35].mxu1  ;;  %v1433_v13 = vrot.slane %v2332_v41, 7 }
0x230a   :  { %1911 = vpow2.f32 %v1567_v14 }
0x230b   :  { %1913 = vtanh.f32 %v1251_v11 }
0x2314   :  { %v1912_v16 = vpop.eup %1911 }
0x2315   :  { %v1260_v17 = vadd.f32 1.0, %v1912_v16  ;;  %v1914_v18 = vpop.eup %1913 }
0x2317   :  { %1915 = vrcp.f32 %v1260_v17 }
0x2321   :  { %v1916_v20 = vpop.eup %1915 }
0x2322   :  { %v1263_v21 = vsel %vm2200_vm3, %v1914_v18, %v1916_v20 }
0x2323   :  { %1266 = vrot.lane.b32.xlu0 %v1263_v21, %s2062_s28  ;;  %v1264_v23 = vmul.f32 %v1263_v21, %v1200_v63 }
0x2395   :  { %v1267_v22 = vpop.permute.xlu0 %1266 }
0x2396   :  { %v1269_v19 = vmul.f32 %v1267_v22, %v1263_v21 }
0x2398   :  { %1271 = vrot.lane.b32.xlu1 %v1269_v19, %s2070_s17 }
0x240a   :  { %v1272_v24 = vpop.permute.xlu1 %1271 }
0x240b   :  { %v1274_v25 = vadd.f32 %v1272_v24, %v1264_v23 }
0x240d   :  { %1917 = vtanh.f32 %v1274_v25 }
0x2417   :  { %v1918_v26 = vpop.eup %1917 }
0x2418   :  { %1277 = vrot.lane.b32.xlu0 %v1918_v26, %s2062_s28 }
0x248a   :  { %v1278_v28 = vpop.permute.xlu0 %1277 }
0x248b   :  { %v1280_v4 = vmul.f32 %v1278_v28, %v1263_v21 }
0x248d   :  { %v1281_v31 = vpack.c.bf16 %v1280_v4, %v1280_v4 }
0x248f   :  { %1283 = vrot.lane.b32.xlu1 %v1281_v31, %s2070_s17 }
0x2501   :  { %v1284_v32 = vpop.permute.xlu1 %1283 }
0x2502   :  { %1771 = vmatmul.mubr.msk.bf16.vlgmr.msra.gmra.mrb[24].mxu0 %vm208_vm4, %v1284_v32 }
0x2503   :  { %1783 = vmatpush3.bf16.msra.mxu0 %v2303_v27  ;;  %1786 = vmatprep.mubr.msk.bf16.mxu0 %vm2068_vm0, %v2067_v0 }
0x2504   :  { %1784 = vmatprep.subr.bf16.mxu0 %v2067_v0 }
0x2507   :  { %1785 = vmatpush3.bf16.msra.mxu0 %v2308_v30 }
0x25d5   :  { %v1324_v33 = vpop.f32.mrb[24].mxu0 }
0x25d6   :  { %v1325_v34 = vadd.f32 %v1324_v33, %v1285_v5  ;;  %v1772_v8 = vpop.f32.mrb[25].mxu0 }
0x25d7   :  { %v1327_v35 = vpop.f32.mrb[26].mxu0 }
0x25d8   :  { %v1569_v36 = vmul.f32 -1.442695, %v1325_v34  ;;  %v1773_v37 = vpop.f32.mrb[27].mxu0 }
0x25da   :  { %1919 = vpow2.f32 %v1569_v36 }
0x25db   :  { %1921 = vtanh.f32 %v1325_v34 }
0x25e4   :  { %v1920_v38 = vpop.eup %1919 }
0x25e5   :  { %v1334_v39 = vadd.f32 1.0, %v1920_v38  ;;  %v1922_v27 = vpop.eup %1921 }
0x25e7   :  { %1923 = vrcp.f32 %v1334_v39 }
0x25f1   :  { %v1924_v40 = vpop.eup %1923 }
0x25f2   :  { %v1337_v0 = vsel %vm2200_vm3, %v1922_v27, %v1924_v40 }
0x25f3   :  { %1340 = vrot.lane.b32.xlu0 %v1337_v0, %s2062_s28  ;;  %v1338_v43 = vmul.f32 %v1337_v0, %v1274_v25 }
0x2665   :  { %v1341_v30 = vpop.permute.xlu0 %1340 }
0x2666   :  { %v1343_v42 = vmul.f32 %v1341_v30, %v1337_v0 }
0x2668   :  { %1345 = vrot.lane.b32.xlu1 %v1343_v42, %s2070_s17 }
0x26da   :  { %v1346_v44 = vpop.permute.xlu1 %1345 }
0x26db   :  { %v1348_v45 = vadd.f32 %v1346_v44, %v1338_v43 }
0x26dd   :  { %1925 = vtanh.f32 %v1348_v45 }
0x26e7   :  { %v1926_v46 = vpop.eup %1925 }
0x26e8   :  { %1351 = vrot.lane.b32.xlu0 %v1926_v46, %s2062_s28 }
0x275a   :  { %v1352_v47 = vpop.permute.xlu0 %1351 }
0x275b   :  { %v1354_v48 = vmul.f32 %v1352_v47, %v1337_v0 }
0x275d   :  { %v1355_v49 = vpack.c.bf16 %v1354_v48, %v1354_v48 }
0x275f   :  { %1357 = vrot.lane.b32.xlu1 %v1355_v49, %s2070_s17 }
0x27d1   :  { %v1358_v50 = vpop.permute.xlu1 %1357 }
0x27d2   :  { %1779 = vmatmul.mubr.msk.bf16.vlgmr.msra.gmra.mrb[36].mxu1 %vm208_vm4, %v1358_v50 }
0x28a5   :  { %v1398_v52 = vpop.f32.mrb[36].mxu1 }
0x28a6   :  { %v1399_v53 = vadd.f32 %v1398_v52, %v1359_v51  ;;  %v1780_v54 = vpop.f32.mrb[37].mxu1 }
0x28a7   :  { %v1401_v55 = vpop.f32.mrb[38].mxu1 }
0x28a8   :  { %v1571_v56 = vmul.f32 -1.442695, %v1399_v53  ;;  %v1781_v57 = vpop.f32.mrb[39].mxu1 }
0x28aa   :  { %1927 = vpow2.f32 %v1571_v56 }
0x28ab   :  { %1929 = vtanh.f32 %v1399_v53 }
0x28b4   :  { %v1928_v58 = vpop.eup %1927 }
0x28b5   :  { %v1408_v59 = vadd.f32 1.0, %v1928_v58  ;;  %v1930_v60 = vpop.eup %1929 }
0x28b7   :  { %1931 = vrcp.f32 %v1408_v59 }
0x28c1   :  { %v1932_v61 = vpop.eup %1931 }
0x28c2   :  { %v1411_v62 = vsel %vm2200_vm3, %v1930_v60, %v1932_v61 }
0x28c3   :  { %1414 = vrot.lane.b32.xlu0 %v1411_v62, %s2062_s28  ;;  %v1412_v2 = vmul.f32 %v1411_v62, %v1348_v45 }
0x2935   :  { %v1415_v63 = vpop.permute.xlu0 %1414 }
0x2936   :  { %v1417_v1 = vmul.f32 %v1415_v63, %v1411_v62 }
0x2938   :  { %1419 = vrot.lane.b32.xlu1 %v1417_v1, %s2070_s17 }
0x29aa   :  { %v1420_v3 = vpop.permute.xlu1 %1419 }
0x29ab   :  { %v1422_v6 = vadd.f32 %v1420_v3, %v1412_v2 }
0x29ad   :  { %1933 = vtanh.f32 %v1422_v6 }
0x29b7   :  { %v1934_v7 = vpop.eup %1933 }
0x29b8   :  { %1425 = vrot.lane.b32.xlu0 %v1934_v7, %s2062_s28 }
0x2a2a   :  { %v1426_v9 = vpop.permute.xlu0 %1425 }
0x2a2b   :  { %v1428_v10 = vmul.f32 %v1426_v9, %v1411_v62 }
0x2a2d   :  { %v1429_v11 = vpack.c.bf16 %v1428_v10, %v1428_v10 }
0x2a2f   :  { %1431 = vrot.lane.b32.xlu1 %v1429_v11, %s2070_s17 }
0x2aa1   :  { %v1432_v12 = vpop.permute.xlu1 %1431 }
0x2aa2   :  { %1787 = vmatmul.mubr.msk.bf16.vlgmr.msra.gmra.mrb[28].mxu0 %vm208_vm4, %v1432_v12 }
0x2b75   :  { %v1472_v14 = vpop.f32.mrb[28].mxu0 }
0x2b76   :  { %v1473_v15 = vadd.f32 %v1472_v14, %v1433_v13  ;;  %v1788_v16 = vpop.f32.mrb[29].mxu0 }
0x2b77   :  { %v1475_v17 = vpop.f32.mrb[30].mxu0 }
0x2b78   :  { %v1573_v18 = vmul.f32 -1.442695, %v1473_v15  ;;  %v1789_v20 = vpop.f32.mrb[31].mxu0 }
0x2b7a   :  { %1935 = vpow2.f32 %v1573_v18 }
0x2b7b   :  { %1937 = vtanh.f32 %v1473_v15 }
0x2b84   :  { %v1936_v21 = vpop.eup %1935 }
0x2b85   :  { %v1482_v22 = vadd.f32 1.0, %v1936_v21  ;;  %v1938_v19 = vpop.eup %1937 }
0x2b87   :  { %1939 = vrcp.f32 %v1482_v22 }
0x2b91   :  { %v1940_v23 = vpop.eup %1939 }
0x2b92   :  { %v1485_v24 = vsel %vm2200_vm3, %v1938_v19, %v1940_v23 }
0x2b93   :  { %1488 = vrot.lane.b32.xlu0 %v1485_v24, %s2062_s28  ;;  %v1486_v26 = vmul.f32 %v1485_v24, %v1422_v6 }
0x2c05   :  { %v1489_v25 = vpop.permute.xlu0 %1488 }
0x2c06   :  { %v1491_v41 = vmul.f32 %v1489_v25, %v1485_v24 }
0x2c08   :  { %1493 = vrot.lane.b32.xlu1 %v1491_v41, %s2070_s17 }
0x2c7a   :  { %v1494_v28 = vpop.permute.xlu1 %1493 }
0x2c7b   :  { %v1496_v4 = vadd.f32 %v1494_v28, %v1486_v26 }
0x2c7d   :  { %1941 = vtanh.f32 %v1496_v4 }
0x2c87   :  { %v1942_v31 = vpop.eup %1941 }
0x2c88   :  { %1499 = vrot.lane.b32.xlu0 %v1942_v31, %s2062_s28 }
0x2cfa   :  { %v1500_v32 = vpop.permute.xlu0 %1499 }
0x2cfb   :  { %v1502_v5 = vmul.f32 %v1500_v32, %v1485_v24 }
0x2cfd   :  { %1504 = vrot.lane.b32.xlu1 %v1502_v5, %s2070_s17 }
0x2d6f   :  { %v1505_v29 = vpop.permute.xlu1 %1504 }
0x2d70   :  { %1508 = vst.msk [vmem:[#allocation10] sm:$0x1] %vm1507_vm12, %v1505_v29 }
0x2d71   :  { %2042 = shalt.err (!%p2039_p8)
}
0x2d72   :  { %s2043_s23 = scalar_lea.hbm %s2442_s5, 16 }
0x2d73   :  { %p2044_p9 = scmp.ne.s32.totalorder %s2442_s5, %s2043_s23  ;;  %p2047_p10 = scmp.lt.u32.totalorder %s2043_s23, %s2442_s5 }
0x2d75   :  { %p2049_p11 = pnand %p2047_p10, %p2044_p9 }
0x2d77   :  { %2052 = shalt.err (!%p2049_p11)
}
0x2d78   :  { %1518 = dma.vmem_to_hbm [thread:$0]  %s1516_s19, 16, %s2442_s5, [#allocation4]  }
0x2d79   :  { %2059 = dma.done.wait [#allocation4], 16  }
0x2d7a   :  { %2060 = vsyncadd [#allocation4], 4294967280 }
0x2d7b   :  { %1522 = vsyncpa [#allocation3], 1 }
0x2d7c   :  { %1523 = vsyncpa [#allocation6], 1 }
0x2d7d   :  { %1524 = vsyncpa [#allocation9], 1 }
0x2d7e   :  { %1525 = vsyncpa [#allocation4], 1 }

</bundles_post_ra>
